<compile_context>
chip_gen: v5e
topology: v5e:2x2
jax: 0.10.0
libtpu: 0.0.40
codegen_flags: <defaults>
</compile_context>

<pallas_src>
import jax
import jax.numpy as jnp
from jax.experimental import pallas as pl
from jax.experimental.pallas import tpu as pltpu

# Logical (PyTorch) dims
D_IN = 784      # 28*28, x.view(-1, 784)
D_HID = 400
D_OUT = 10

# Lane-dense padded dims
D_HID_PAD = 512   # 4 * 128
D_OUT_PAD = 128   # 1 * 128


def rps_mlp_kernel(x_ref, w1_ref, b1_ref, w2_ref, b2_ref, w3_ref, out_ref):
    # x arrives as f32 straight from HBM; cast to bf16 in-kernel (avoids a
    # separate wrapper-side cast pass over HBM).
    x = x_ref[...].astype(jnp.bfloat16)
    # Layer 1: (TB, 784) @ (784, 512), bf16 operands, f32 accumulation on MXU.
    h1 = jnp.dot(x, w1_ref[...], preferred_element_type=jnp.float32)
    h1 = jnp.maximum(h1 + b1_ref[...], 0.0).astype(jnp.bfloat16)
    # Layer 2: (TB, 512) @ (512, 512)
    h2 = jnp.dot(h1, w2_ref[...], preferred_element_type=jnp.float32)
    h2 = jnp.maximum(h2 + b2_ref[...], 0.0).astype(jnp.bfloat16)
    # Final fc (no bias): (TB, 512) @ (512, 128), lane-dense f32 output store.
    out_ref[...] = jnp.dot(h2, w3_ref[...], preferred_element_type=jnp.float32)


def _pad_params(params):
    """Zero-pad to lane-dense widths; weights -> bf16, biases stay f32."""
    w1, b1, w2, b2, w3 = params
    w1p = jnp.zeros((D_IN, D_HID_PAD), jnp.bfloat16).at[:, :D_HID].set(
        w1.astype(jnp.bfloat16))
    b1p = jnp.zeros((1, D_HID_PAD), jnp.float32).at[:, :D_HID].set(
        b1.astype(jnp.float32))
    w2p = jnp.zeros((D_HID_PAD, D_HID_PAD), jnp.bfloat16).at[:D_HID, :D_HID].set(
        w2.astype(jnp.bfloat16))
    b2p = jnp.zeros((1, D_HID_PAD), jnp.float32).at[:, :D_HID].set(
        b2.astype(jnp.float32))
    w3p = jnp.zeros((D_HID_PAD, D_OUT_PAD), jnp.bfloat16).at[:D_HID, :D_OUT].set(
        w3.astype(jnp.bfloat16))
    return w1p, b1p, w2p, b2p, w3p


def _round_down(v, m):
    return (v // m) * m


def _pick_batch_tile(B, batch_tile):
    """Batch tile: multiple of 8, <= round_up(B, 8); >= 2 grid steps for v7x."""
    if B < 8:
        return B                      # block == full batch dim (legal)
    if B < 512:
        return _round_down(B, 8)      # one-ish tile; ragged remainder handled
    if B < 2 * batch_tile:
        # Guarantee >= 2 grid steps so the "parallel" batch axis can be split
        # across v7x's two TensorCores; keep tiles a multiple of 256 MXU rows.
        return max(256, min(batch_tile, _round_down(pl.cdiv(B, 2), 256)))
    return batch_tile


def rps_net_mlp_forward(x, params, *, batch_tile=1024):
    """x: any shape with total elements divisible by 784 (mirrors x.view(-1, 784)).

    params: (w1 (784,400), b1 (1,400), w2 (400,400), b2 (1,400), w3 (400,10)),
    i.e. PyTorch weights transposed to (in_features, out_features).
    Returns (B, 10) f32 logits.
    """
    x2d = jnp.reshape(x, (-1, D_IN))          # keep input dtype (f32); no copy
    B = x2d.shape[0]

    TB = _pick_batch_tile(B, batch_tile)
    n_tiles = pl.cdiv(B, TB)                  # ragged last block: no jnp.pad

    w1, b1, w2, b2, w3 = _pad_params(params)

    const = lambda i: (0, 0)  # resident weights/biases: same block every step

    flops = 2 * B * (D_IN * D_HID_PAD + D_HID_PAD * D_HID_PAD
                     + D_HID_PAD * D_OUT_PAD)
    bytes_accessed = (
        int(x2d.size) * x2d.dtype.itemsize
        + sum(int(a.size) * a.dtype.itemsize for a in (w1, b1, w2, b2, w3))
        + B * D_OUT_PAD * 4
    )

    out_pad = pl.pallas_call(
        rps_mlp_kernel,
        out_shape=jax.ShapeDtypeStruct((B, D_OUT_PAD), jnp.float32),
        grid=(n_tiles,),
        in_specs=[
            pl.BlockSpec((TB, D_IN), lambda i: (i, 0)),           # x tile (pipelined)
            pl.BlockSpec((D_IN, D_HID_PAD), const),               # w1 (resident)
            pl.BlockSpec((1, D_HID_PAD), const),                  # b1
            pl.BlockSpec((D_HID_PAD, D_HID_PAD), const),          # w2
            pl.BlockSpec((1, D_HID_PAD), const),                  # b2
            pl.BlockSpec((D_HID_PAD, D_OUT_PAD), const),          # w3
        ],
        out_specs=pl.BlockSpec((TB, D_OUT_PAD), lambda i: (i, 0)),
        compiler_params=pltpu.CompilerParams(
            dimension_semantics=("parallel",),          # shard batch across TCs (v7x)
            vmem_limit_bytes=32 * 1024 * 1024,          # safe on v5e/v6e/v7x
        ),
        cost_estimate=pl.CostEstimate(
            flops=flops, transcendentals=0, bytes_accessed=bytes_accessed),
    )(x2d, w1, b1, w2, b2, w3)

    return out_pad[:, :D_OUT]


def init_params(key):
    """Deterministic init matching nn.Linear default U(-1/sqrt(fan_in), +1/sqrt(fan_in)).

    Weights are stored as (in_features, out_features) so the kernel computes
    y = x @ W + b.  The final fc has bias=False, matching the PyTorch module.
    """
    k1, k2, k3, k4, k5, _ = jax.random.split(key, 6)

    def lin(kw, kb, fan_in, fan_out, bias=True):
        bound = 1.0 / jnp.sqrt(jnp.float32(fan_in))
        w = jax.random.uniform(kw, (fan_in, fan_out), jnp.float32, -bound, bound)
        if bias:
            b = jax.random.uniform(kb, (1, fan_out), jnp.float32, -bound, bound)
            return w, b
        return w

    w1, b1 = lin(k1, k2, D_IN, D_HID)
    w2, b2 = lin(k3, k4, D_HID, D_HID)
    w3 = lin(k5, None, D_HID, D_OUT, bias=False)
    return (w1, b1, w2, b2, w3)


def _reference_forward(x, params):
    """Pure-JAX reference using the same bf16-weight / f32-accumulate scheme."""
    w1, b1, w2, b2, w3 = params
    x2d = jnp.reshape(x, (-1, D_IN)).astype(jnp.bfloat16)
    h1 = jnp.dot(x2d, w1.astype(jnp.bfloat16), preferred_element_type=jnp.float32)
    h1 = jnp.maximum(h1 + b1, 0.0).astype(jnp.bfloat16)
    h2 = jnp.dot(h1, w2.astype(jnp.bfloat16), preferred_element_type=jnp.float32)
    h2 = jnp.maximum(h2 + b2, 0.0).astype(jnp.bfloat16)
    return jnp.dot(h2, w3.astype(jnp.bfloat16), preferred_element_type=jnp.float32)


if __name__ == "__main__":
    key = jax.random.PRNGKey(0)
    kx, kp = jax.random.split(key)
    params = init_params(kp)

    # MNIST-like input in NCHW, batch=8 (784 input features are fixed by the module).
    x = jax.random.normal(kx, (8, 1, 28, 28), dtype=jnp.float32)
    out = jax.block_until_ready(rps_net_mlp_forward(x, params))
    assert out.shape == (8, 10) and out.dtype == jnp.float32
    ref = _reference_forward(x, params)
    assert jnp.allclose(out, ref, atol=1e-3, rtol=1e-3), (
        f"max abs err {jnp.max(jnp.abs(out - ref))}")

    # Non-multiple-of-8 batch exercises the ragged (no jnp.pad) path.
    x2 = jax.random.normal(kx, (10, 784), dtype=jnp.float32)
    out2 = jax.block_until_ready(rps_net_mlp_forward(x2, params))
    assert out2.shape == (10, 10)
    ref2 = _reference_forward(x2, params)
    assert jnp.allclose(out2, ref2, atol=1e-3, rtol=1e-3), (
        f"max abs err {jnp.max(jnp.abs(out2 - ref2))}")

    print("KERNEL_OK")
</pallas_src>

<mosaic_0001>
module attributes {stable_mosaic.version = 11 : i64} {
  func.func @rps_mlp_kernel(%arg0: i32, %arg1: memref<8x784xf32, #tpu.memory_space<vmem>>, %arg2: memref<784x512xbf16, #tpu.memory_space<vmem>>, %arg3: memref<1x512xf32, #tpu.memory_space<vmem>>, %arg4: memref<512x512xbf16, #tpu.memory_space<vmem>>, %arg5: memref<1x512xf32, #tpu.memory_space<vmem>>, %arg6: memref<512x128xbf16, #tpu.memory_space<vmem>>, %arg7: memref<8x128xf32, #tpu.memory_space<vmem>>) attributes {dimension_semantics = [#tpu.dimension_semantics<parallel>], iteration_bounds = array<i64: 1>, scalar_prefetch = 0 : i64, scratch_operands = 0 : i64, tpu.core_type = #tpu.core_type<tc>, window_params = [{transform_indices = @transform_0, window_bounds = array<i64: 8, 784>}, {pipeline_mode = #tpu.pipeline_mode<synchronous>, transform_indices = @transform_1, window_bounds = array<i64: 784, 512>}, {pipeline_mode = #tpu.pipeline_mode<synchronous>, transform_indices = @transform_2, window_bounds = array<i64: 1, 512>}, {pipeline_mode = #tpu.pipeline_mode<synchronous>, transform_indices = @transform_3, window_bounds = array<i64: 512, 512>}, {pipeline_mode = #tpu.pipeline_mode<synchronous>, transform_indices = @transform_4, window_bounds = array<i64: 1, 512>}, {pipeline_mode = #tpu.pipeline_mode<synchronous>, transform_indices = @transform_5, window_bounds = array<i64: 512, 128>}, {transform_indices = @transform_6, window_bounds = array<i64: 8, 128>}]} {
    %c0 = arith.constant 0 : index
    %c0_0 = arith.constant 0 : index
    %0 = vector.load %arg1[%c0, %c0_0] : memref<8x784xf32, #tpu.memory_space<vmem>>, vector<8x784xf32>
    %1 = arith.truncf %0 : vector<8x784xf32> to vector<8x784xbf16>
    %c0_1 = arith.constant 0 : index
    %c0_2 = arith.constant 0 : index
    %2 = vector.load %arg2[%c0_1, %c0_2] : memref<784x512xbf16, #tpu.memory_space<vmem>>, vector<784x512xbf16>
    %cst = arith.constant dense<0.000000e+00> : vector<8x512xf32>
    %3 = tpu.matmul %1, %2, %cst {dimension_numbers = #tpu.dot_dimension_numbers<[1], [0], [0], [1], [0, 0, 1, 1], [], []>} : vector<8x784xbf16>, vector<784x512xbf16>, vector<8x512xf32> -> vector<8x512xf32>
    %c0_3 = arith.constant 0 : index
    %c0_4 = arith.constant 0 : index
    %4 = vector.load %arg3[%c0_3, %c0_4] : memref<1x512xf32, #tpu.memory_space<vmem>>, vector<1x512xf32>
    %5 = vector.broadcast %4 : vector<1x512xf32> to vector<8x512xf32>
    %6 = arith.addf %3, %5 : vector<8x512xf32>
    %cst_5 = arith.constant 0.000000e+00 : f32
    %7 = vector.broadcast %cst_5 : f32 to vector<8x512xf32>
    %8 = arith.maximumf %6, %7 : vector<8x512xf32>
    %9 = arith.truncf %8 : vector<8x512xf32> to vector<8x512xbf16>
    %c0_6 = arith.constant 0 : index
    %c0_7 = arith.constant 0 : index
    %10 = vector.load %arg4[%c0_6, %c0_7] : memref<512x512xbf16, #tpu.memory_space<vmem>>, vector<512x512xbf16>
    %cst_8 = arith.constant dense<0.000000e+00> : vector<8x512xf32>
    %11 = tpu.matmul %9, %10, %cst_8 {dimension_numbers = #tpu.dot_dimension_numbers<[1], [0], [0], [1], [0, 0, 1, 1], [], []>} : vector<8x512xbf16>, vector<512x512xbf16>, vector<8x512xf32> -> vector<8x512xf32>
    %c0_9 = arith.constant 0 : index
    %c0_10 = arith.constant 0 : index
    %12 = vector.load %arg5[%c0_9, %c0_10] : memref<1x512xf32, #tpu.memory_space<vmem>>, vector<1x512xf32>
    %13 = vector.broadcast %12 : vector<1x512xf32> to vector<8x512xf32>
    %14 = arith.addf %11, %13 : vector<8x512xf32>
    %cst_11 = arith.constant 0.000000e+00 : f32
    %15 = vector.broadcast %cst_11 : f32 to vector<8x512xf32>
    %16 = arith.maximumf %14, %15 : vector<8x512xf32>
    %17 = arith.truncf %16 : vector<8x512xf32> to vector<8x512xbf16>
    %c0_12 = arith.constant 0 : index
    %c0_13 = arith.constant 0 : index
    %18 = vector.load %arg6[%c0_12, %c0_13] : memref<512x128xbf16, #tpu.memory_space<vmem>>, vector<512x128xbf16>
    %cst_14 = arith.constant dense<0.000000e+00> : vector<8x128xf32>
    %19 = tpu.matmul %17, %18, %cst_14 {dimension_numbers = #tpu.dot_dimension_numbers<[1], [0], [0], [1], [0, 0, 1, 1], [], []>} : vector<8x512xbf16>, vector<512x128xbf16>, vector<8x128xf32> -> vector<8x128xf32>
    %c0_15 = arith.constant 0 : index
    %c0_16 = arith.constant 0 : index
    %20 = vector.load %arg7[%c0_15, %c0_16] : memref<8x128xf32, #tpu.memory_space<vmem>>, vector<8x128xf32>
    tpu.vector_store %arg7[%c0_15, %c0_16], %19 {strides = array<i32>} : memref<8x128xf32, #tpu.memory_space<vmem>>, vector<8x128xf32>,
    return
  }
  func.func @transform_0(%arg0: i32) -> (i32, i32) {
    %c0_i32 = arith.constant 0 : i32
    %c0_i32_0 = arith.constant 0 : i32
    return %arg0, %c0_i32 : i32, i32
  }
  func.func @transform_1(%arg0: i32) -> (i32, i32) {
    %c0_i32 = arith.constant 0 : i32
    %c0_i32_0 = arith.constant 0 : i32
    %c0_i32_1 = arith.constant 0 : i32
    return %c0_i32, %c0_i32_0 : i32, i32
  }
  func.func @transform_2(%arg0: i32) -> (i32, i32) {
    %c0_i32 = arith.constant 0 : i32
    %c0_i32_0 = arith.constant 0 : i32
    %c0_i32_1 = arith.constant 0 : i32
    return %c0_i32, %c0_i32_0 : i32, i32
  }
  func.func @transform_3(%arg0: i32) -> (i32, i32) {
    %c0_i32 = arith.constant 0 : i32
    %c0_i32_0 = arith.constant 0 : i32
    %c0_i32_1 = arith.constant 0 : i32
    return %c0_i32, %c0_i32_0 : i32, i32
  }
  func.func @transform_4(%arg0: i32) -> (i32, i32) {
    %c0_i32 = arith.constant 0 : i32
    %c0_i32_0 = arith.constant 0 : i32
    %c0_i32_1 = arith.constant 0 : i32
    return %c0_i32, %c0_i32_0 : i32, i32
  }
  func.func @transform_5(%arg0: i32) -> (i32, i32) {
    %c0_i32 = arith.constant 0 : i32
    %c0_i32_0 = arith.constant 0 : i32
    %c0_i32_1 = arith.constant 0 : i32
    return %c0_i32, %c0_i32_0 : i32, i32
  }
  func.func @transform_6(%arg0: i32) -> (i32, i32) {
    %c0_i32 = arith.constant 0 : i32
    %c0_i32_0 = arith.constant 0 : i32
    return %arg0, %c0_i32 : i32, i32
  }
}

</mosaic_0001>

<bundles_post_ra>
// kernel: tpu_custom_call.1
= control target key start
LH: loop header
LB: loop body
LE: loop exit
PB: predicated region body
PF: predicated region fallthrough
CT: control target
= control target key end

     0   :  { %11 = vsyncpa [#allocation3], 0  ;;  %s5185_s0 = inlined_call_operand.hbm [shape: f32[8,784], index: 0, kind: input, shape index: {}]   ;;  %s5186_s1 = inlined_call_operand.hbm [shape: bf16[784,512], index: 1, kind: input, shape index: {}]   ;;  %s5187_s2 = inlined_call_operand.hbm [shape: f32[1,512], index: 2, kind: input, shape index: {}]   ;;  %s5188_s3 = inlined_call_operand.hbm [shape: bf16[512,512], index: 3, kind: input, shape index: {}]   ;;  %s5189_s4 = inlined_call_operand.hbm [shape: f32[1,512], index: 4, kind: input, shape index: {}]   ;;  %s5190_s5 = inlined_call_operand.hbm [shape: bf16[512,128], index: 5, kind: input, shape index: {}]   ;;  %s5191_s6 = inlined_call_operand.hbm [shape: f32[8,128], index: 6, kind: output, shape index: {}]  }
   0x1   :  { %12 = vsyncpa [#allocation6], 0 }
   0x2   :  { %13 = vsyncpa [#allocation9], 0 }
   0x3   :  { %14 = vsyncpa [#allocation12], 0  ;;  %s31_s23 = sshll.u32 %s5186_s1, 4  ;;  %s32_s23 = int_to_ptr.hbm [resolvable:$true] %s31_s23 }
   0x4   :  { %15 = vsyncpa [#allocation4], 0  ;;  %s4985_s24 = smov [#allocation5]   ;;  %s55_s28 = sshll.u32 %s5188_s3, 4  ;;  %s56_s28 = int_to_ptr.hbm [resolvable:$true] %s55_s28 }
   0x5   :  { %s33_s25 = sshll.u32 %s4985_s24, 4  ;;  %s4986_s29 = smov 256   ;;  %s34_s25 = int_to_ptr.vmem [resolvable:$true] %s33_s25 }
   0x6   :  { %s4987_s30 = smov 16   ;;  %s4988_s7 = smov [#allocation8]  }
   0x7   :  { %39 = dma.hbm_to_vmem [thread:$0]  %s32_s23, 25088, %s34_s25, [#allocation6], %s4986_s29, %s4986_s29, %s4987_s30  }
   0x8   :  { %s57_s8 = sshll.u32 %s4988_s7, 4  ;;  %s21_s11 = sshll.u32 %s5185_s0, 4  ;;  %s58_s8 = int_to_ptr.vmem [resolvable:$true] %s57_s8  ;;  %s22_s11 = int_to_ptr.hbm [resolvable:$true] %s21_s11 }
   0x9   :  { %63 = dma.hbm_to_vmem [thread:$0]  %s56_s28, 16384, %s58_s8, [#allocation9], %s4986_s29, %s4986_s29, %s4987_s30  }
   0xa   :  { %s45_s13 = sshll.u32 %s5187_s2, 4  ;;  %s4989_s14 = smov [#allocation2]   ;;  %s46_s13 = int_to_ptr.hbm [resolvable:$true] %s45_s13 }
   0xb   :  { %s23_s15 = sshll.u32 %s4989_s14, 4  ;;  %s4990_s3 = smov [#allocation7]   ;;  %s24_s15 = int_to_ptr.vmem [resolvable:$true] %s23_s15 }
   0xc   :  { %26 = dma.hbm_to_vmem [thread:$0]  %s22_s11, 896, %s24_s15, [#allocation3]  }
   0xd   :  { %s47_s16 = sshll.u32 %s4990_s3, 4  ;;  %s69_s19 = sshll.u32 %s5189_s4, 4  ;;  %s48_s16 = int_to_ptr.vmem [resolvable:$true] %s47_s16  ;;  %s70_s19 = int_to_ptr.hbm [resolvable:$true] %s69_s19 }
   0xe   :  { %50 = dma.hbm_to_vmem [thread:$0]  %s46_s13, 64, %s48_s16, [#allocation6]  }
   0xf   :  { %s79_s21 = sshll.u32 %s5190_s5, 4  ;;  %s4991_s22 = smov [#allocation10]   ;;  %s80_s21 = int_to_ptr.hbm [resolvable:$true] %s79_s21 }
  0x10   :  { %s71_s2 = sshll.u32 %s4991_s22, 4  ;;  %s4992_s23 = smov [#allocation11]   ;;  %s72_s2 = int_to_ptr.vmem [resolvable:$true] %s71_s2 }
  0x11   :  { %74 = dma.hbm_to_vmem [thread:$0]  %s70_s19, 64, %s72_s2, [#allocation9]  }
  0x12   :  { %s81_s24 = sshll.u32 %s4992_s23, 4  ;;  %s4993_s25 = smov 64   ;;  %s82_s24 = int_to_ptr.vmem [resolvable:$true] %s81_s24 }
  0x13   :  { %s4994_s26 = smov 4  }
  0x14   :  { %87 = dma.hbm_to_vmem [thread:$0]  %s80_s21, 4096, %s82_s24, [#allocation12], %s4993_s25, %s4993_s25, %s4994_s26  }
  0x15   :  { %4975 = dma.done.wait [#allocation3], 896  }
  0x16   :  { %4976 = vsyncadd [#allocation3], 4294966400 }
  0x17   :  { %4977 = dma.done.wait [#allocation6], 25152  }
  0x18   :  { %4978 = vsyncadd [#allocation6], 4294942144 }
  0x19   :  { %4979 = dma.done.wait [#allocation9], 16448  }
  0x1a   :  { %4980 = vsyncadd [#allocation9], 4294950848 }
  0x1b   :  { %4981 = dma.done.wait [#allocation12], 4096  }
  0x1c   :  { %4982 = vsyncadd [#allocation12], 4294963200  ;;  %v3126_v0 = vld [vmem:[#allocation5 + $0xe0] sm:$0xf]  ;;  %v4470_v1 = vld [vmem:[#allocation5 + $0xec] sm:$0xf0] }
  0x1d   :  { %v3254_v2 = vld [vmem:[#allocation5 + $0x1e0] sm:$0xf]  ;;  %v3127_v3 = vor.u32 %v4470_v1, %v3126_v0  ;;  %v4502_v4 = vld [vmem:[#allocation5 + $0x1ec] sm:$0xf0]  ;;  %vm1313_vm0 = vcmask 130048   ;;  %s4995_s4 = smov [#allocation13]  }
  0x1e   :  { %v3382_v5 = vld [vmem:[#allocation5 + $0x2e0] sm:$0xf]  ;;  %v4534_v6 = vld [vmem:[#allocation5 + $0x2ec] sm:$0xf0]  ;;  %v3255_v7 = vor.u32 %v4502_v4, %v3254_v2  ;;  %s2997_s5 = sshll.u32 %s4995_s4, 4  ;;  %s2999_s29 = sshll.u32 %s5191_s6, 4  ;;  %s2998_s5 = int_to_ptr.vmem [resolvable:$true] %s2997_s5  ;;  %s3000_s29 = int_to_ptr.hbm [resolvable:$true] %s2999_s29 }
  0x1f   :  { %v3383_v8 = vor.u32 %v4534_v6, %v3382_v5  ;;  %v3510_v9 = vld [vmem:[#allocation5 + $0x3e0] sm:$0xf]  ;;  %v4566_v10 = vld [vmem:[#allocation5 + $0x3ec] sm:$0xf0]  ;;  %1317 = vmatpush.bf16.msra.mxu0 %v3127_v3 }
  0x20   :  { %v3110_v11 = vld [vmem:[#allocation5 + $0xc0] sm:$0xf]  ;;  %v3511_v12 = vor.u32 %v4566_v10, %v3510_v9  ;;  %v4466_v13 = vld [vmem:[#allocation5 + $0xcc] sm:$0xf0]  ;;  %1330 = vmatpush.bf16.msra.mxu1 %v3255_v7 }
  0x21   :  { %v3238_v14 = vld [vmem:[#allocation5 + $0x1c0] sm:$0xf]  ;;  %v4498_v15 = vld [vmem:[#allocation5 + $0x1cc] sm:$0xf0]  ;;  %1343 = vmatpush.bf16.msra.mxu2 %v3383_v8  ;;  %v3111_v16 = vor.u32 %v4466_v13, %v3110_v11 }
  0x22   :  { %v3239_v17 = vor.u32 %v4498_v15, %v3238_v14  ;;  %v3366_v18 = vld [vmem:[#allocation5 + $0x2c0] sm:$0xf]  ;;  %v4530_v19 = vld [vmem:[#allocation5 + $0x2cc] sm:$0xf0]  ;;  %1356 = vmatpush.bf16.msra.mxu3 %v3511_v12 }
  0x23   :  { %v3494_v20 = vld [vmem:[#allocation5 + $0x3c0] sm:$0xf]  ;;  %v3367_v21 = vor.u32 %v4530_v19, %v3366_v18  ;;  %v4562_v22 = vld [vmem:[#allocation5 + $0x3cc] sm:$0xf0]  ;;  %1318 = vmatpush.bf16.msra.mxu0 %v3111_v16 }
  0x24   :  { %v3094_v23 = vld [vmem:[#allocation5 + $0xa0] sm:$0xf]  ;;  %v4462_v24 = vld [vmem:[#allocation5 + $0xac] sm:$0xf0]  ;;  %v3495_v25 = vor.u32 %v4562_v22, %v3494_v20  ;;  %1331 = vmatpush.bf16.msra.mxu1 %v3239_v17 }
  0x25   :  { %v3222_v26 = vld [vmem:[#allocation5 + $0x1a0] sm:$0xf]  ;;  %v4494_v27 = vld [vmem:[#allocation5 + $0x1ac] sm:$0xf0]  ;;  %v3095_v29 = vor.u32 %v4462_v24, %v3094_v23  ;;  %1344 = vmatpush.bf16.msra.mxu2 %v3367_v21 }
  0x26   :  { %v3350_v28 = vld [vmem:[#allocation5 + $0x2a0] sm:$0xf]  ;;  %v4526_v30 = vld [vmem:[#allocation5 + $0x2ac] sm:$0xf0]  ;;  %v3223_v33 = vor.u32 %v4494_v27, %v3222_v26  ;;  %1357 = vmatpush.bf16.msra.mxu3 %v3495_v25 }
  0x27   :  { %v3478_v31 = vld [vmem:[#allocation5 + $0x3a0] sm:$0xf]  ;;  %v4558_v32 = vld [vmem:[#allocation5 + $0x3ac] sm:$0xf0]  ;;  %v3351_v34 = vor.u32 %v4526_v30, %v3350_v28  ;;  %1319 = vmatpush.bf16.msra.mxu0 %v3095_v29 }
  0x28   :  { %v3078_v35 = vld [vmem:[#allocation5 + $0x80] sm:$0xf]  ;;  %v4458_v36 = vld [vmem:[#allocation5 + $0x8c] sm:$0xf0]  ;;  %v3479_v38 = vor.u32 %v4558_v32, %v3478_v31  ;;  %1332 = vmatpush.bf16.msra.mxu1 %v3223_v33  ;;  %v4468_v33 = vld [vmem:[#allocation5 + $0xe4] sm:$0xf] }
  0x29   :  { %v3206_v37 = vld [vmem:[#allocation5 + $0x180] sm:$0xf]  ;;  %v4490_v39 = vld [vmem:[#allocation5 + $0x18c] sm:$0xf0]  ;;  %v3079_v44 = vor.u32 %v4458_v36, %v3078_v35  ;;  %1345 = vmatpush.bf16.msra.mxu2 %v3351_v34  ;;  %v3128_v34 = vld [vmem:[#allocation5 + $0xf0] sm:$0xf0] }
  0x2a   :  { %v3334_v40 = vld [vmem:[#allocation5 + $0x280] sm:$0xf]  ;;  %v4522_v41 = vld [vmem:[#allocation5 + $0x28c] sm:$0xf0]  ;;  %v3207_v45 = vor.u32 %v4490_v39, %v3206_v37  ;;  %1358 = vmatpush.bf16.msra.mxu3 %v3479_v38  ;;  %v115_v35 = vld [vmem:[#allocation2 + $0x10] sm:$0xff] }
  0x2b   :  { %v3462_v42 = vld [vmem:[#allocation5 + $0x380] sm:$0xf]  ;;  %v4554_v43 = vld [vmem:[#allocation5 + $0x38c] sm:$0xf0]  ;;  %v3335_v46 = vor.u32 %v4522_v41, %v3334_v40  ;;  %1320 = vmatpush.bf16.msra.mxu0 %v3079_v44  ;;  %v113_v40 = vld [vmem:[#allocation2] sm:$0xff] }
  0x2c   :  { %v3062_v47 = vld [vmem:[#allocation5 + $0x60] sm:$0xf]  ;;  %v4454_v48 = vld [vmem:[#allocation5 + $0x6c] sm:$0xf0]  ;;  %v3463_v50 = vor.u32 %v4554_v43, %v3462_v42  ;;  %1333 = vmatpush.bf16.msra.mxu1 %v3207_v45  ;;  %v4500_v43 = vld [vmem:[#allocation5 + $0x1e4] sm:$0xf] }
  0x2d   :  { %v3190_v49 = vld [vmem:[#allocation5 + $0x160] sm:$0xf]  ;;  %v4486_v51 = vld [vmem:[#allocation5 + $0x16c] sm:$0xf0]  ;;  %v3063_v56 = vor.u32 %v4454_v48, %v3062_v47  ;;  %1346 = vmatpush.bf16.msra.mxu2 %v3335_v46  ;;  %v3256_v44 = vld [vmem:[#allocation5 + $0x1f0] sm:$0xf0]  ;;  %v3131_v47 = vor.u32 %v4468_v33, %v3128_v34 }
  0x2e   :  { %v3318_v52 = vld [vmem:[#allocation5 + $0x260] sm:$0xf]  ;;  %v4518_v53 = vld [vmem:[#allocation5 + $0x26c] sm:$0xf0]  ;;  %v3191_v57 = vor.u32 %v4486_v51, %v3190_v49  ;;  %1359 = vmatpush.bf16.msra.mxu3 %v3463_v50  ;;  %v5049_v51 = vpack.c.bf16 %v115_v35, %v115_v35  ;;  %v4484_v35 = vld [vmem:[#allocation5 + $0x164] sm:$0xf] }
  0x2f   :  { %v3446_v54 = vld [vmem:[#allocation5 + $0x360] sm:$0xf]  ;;  %v4550_v55 = vld [vmem:[#allocation5 + $0x36c] sm:$0xf0]  ;;  %v3319_v58 = vor.u32 %v4518_v53, %v3318_v52  ;;  %1321 = vmatpush.bf16.msra.mxu0 %v3063_v56  ;;  %v4464_v53 = vld [vmem:[#allocation5 + $0xc4] sm:$0xf] }
  0x30   :  { %v3046_v59 = vld [vmem:[#allocation5 + $0x40] sm:$0xf]  ;;  %v4450_v60 = vld [vmem:[#allocation5 + $0x4c] sm:$0xf0]  ;;  %v3447_v62 = vor.u32 %v4550_v55, %v3446_v54  ;;  %1334 = vmatpush.bf16.msra.mxu1 %v3191_v57  ;;  %v3112_v54 = vld [vmem:[#allocation5 + $0xd0] sm:$0xf0]  ;;  %v5051_v55 = vpack.c.bf16 %v113_v40, %v113_v40 }
  0x31   :  { %v3174_v61 = vld [vmem:[#allocation5 + $0x140] sm:$0xf]  ;;  %v4482_v63 = vld [vmem:[#allocation5 + $0x14c] sm:$0xf0]  ;;  %v3047_v4 = vor.u32 %v4450_v60, %v3046_v59  ;;  %1347 = vmatpush.bf16.msra.mxu2 %v3319_v58  ;;  %v3259_v59 = vor.u32 %v4500_v43, %v3256_v44  ;;  %v4448_v43 = vld [vmem:[#allocation5 + $0x44] sm:$0xf] }
  0x32   :  { %v3302_v0 = vld [vmem:[#allocation5 + $0x240] sm:$0xf]  ;;  %v4514_v1 = vld [vmem:[#allocation5 + $0x24c] sm:$0xf0]  ;;  %v3175_v5 = vor.u32 %v4482_v63, %v3174_v61  ;;  %1360 = vmatpush.bf16.msra.mxu3 %v3447_v62  ;;  %v4496_v61 = vld [vmem:[#allocation5 + $0x1c4] sm:$0xf] }
  0x33   :  { %v3430_v2 = vld [vmem:[#allocation5 + $0x340] sm:$0xf]  ;;  %v4546_v3 = vld [vmem:[#allocation5 + $0x34c] sm:$0xf0]  ;;  %v3303_v6 = vor.u32 %v4514_v1, %v3302_v0  ;;  %1322 = vmatpush.bf16.msra.mxu0 %v3047_v4  ;;  %v3240_v62 = vld [vmem:[#allocation5 + $0x1d0] sm:$0xf0]  ;;  %v3115_v0 = vor.u32 %v4464_v53, %v3112_v54 }
  0x34   :  { %v3030_v7 = vld [vmem:[#allocation5 + $0x20] sm:$0xf]  ;;  %v4446_v8 = vld [vmem:[#allocation5 + $0x2c] sm:$0xf0]  ;;  %v3431_v10 = vor.u32 %v4546_v3, %v3430_v2  ;;  %1335 = vmatpush.bf16.msra.mxu1 %v3175_v5  ;;  %v4460_v5 = vld [vmem:[#allocation5 + $0xa4] sm:$0xf] }
  0x35   :  { %v3158_v9 = vld [vmem:[#allocation5 + $0x120] sm:$0xf]  ;;  %v4478_v11 = vld [vmem:[#allocation5 + $0x12c] sm:$0xf0]  ;;  %v3031_v16 = vor.u32 %v4446_v8, %v3030_v7  ;;  %1348 = vmatpush.bf16.msra.mxu2 %v3303_v6  ;;  %v3096_v6 = vld [vmem:[#allocation5 + $0xb0] sm:$0xf0]  ;;  %v3243_v8 = vor.u32 %v4496_v61, %v3240_v62 }
  0x36   :  { %v3286_v12 = vld [vmem:[#allocation5 + $0x220] sm:$0xf]  ;;  %v4510_v13 = vld [vmem:[#allocation5 + $0x22c] sm:$0xf0]  ;;  %v3159_v20 = vor.u32 %v4478_v11, %v3158_v9  ;;  %1361 = vmatpush.bf16.msra.mxu3 %v3431_v10  ;;  %v4492_v10 = vld [vmem:[#allocation5 + $0x1a4] sm:$0xf] }
  0x37   :  { %v3414_v14 = vld [vmem:[#allocation5 + $0x320] sm:$0xf]  ;;  %v4542_v15 = vld [vmem:[#allocation5 + $0x32c] sm:$0xf0]  ;;  %v3287_v21 = vor.u32 %v4510_v13, %v3286_v12  ;;  %1323 = vmatpush.bf16.msra.mxu0 %v3031_v16  ;;  %v3224_v11 = vld [vmem:[#allocation5 + $0x1b0] sm:$0xf0]  ;;  %v3099_v13 = vor.u32 %v4460_v5, %v3096_v6 }
  0x38   :  { %v3014_v17 = vld [vmem:[#allocation5] sm:$0xf]  ;;  %v4442_v18 = vld [vmem:[#allocation5 + $0xc] sm:$0xf0]  ;;  %v3415_v25 = vor.u32 %v4542_v15, %v3414_v14  ;;  %1336 = vmatpush.bf16.msra.mxu1 %v3159_v20  ;;  %v3227_v20 = vor.u32 %v4492_v10, %v3224_v11  ;;  %v3048_v44 = vld [vmem:[#allocation5 + $0x50] sm:$0xf0] }
  0x39   :  { %v3142_v19 = vld [vmem:[#allocation5 + $0x100] sm:$0xf]  ;;  %v4474_v22 = vld [vmem:[#allocation5 + $0x10c] sm:$0xf0]  ;;  %v3015_v32 = vor.u32 %v4442_v18, %v3014_v17  ;;  %1349 = vmatpush.bf16.msra.mxu2 %v3287_v21  ;;  %v4456_v18 = vld [vmem:[#allocation5 + $0x84] sm:$0xf] }
  0x3a   :  { %v3270_v23 = vld [vmem:[#allocation5 + $0x200] sm:$0xf]  ;;  %v4506_v24 = vld [vmem:[#allocation5 + $0x20c] sm:$0xf0]  ;;  %v3143_v36 = vor.u32 %v4474_v22, %v3142_v19  ;;  %1362 = vmatpush.bf16.msra.mxu3 %v3415_v25  ;;  %v3080_v19 = vld [vmem:[#allocation5 + $0x90] sm:$0xf0] }
  0x3b   :  { %v3398_v26 = vld [vmem:[#allocation5 + $0x300] sm:$0xf]  ;;  %v4538_v27 = vld [vmem:[#allocation5 + $0x30c] sm:$0xf0]  ;;  %v3271_v37 = vor.u32 %v4506_v24, %v3270_v23  ;;  %1324 = vmatpush.bf16.msra.mxu0 %v3015_v32  ;;  %v4488_v22 = vld [vmem:[#allocation5 + $0x184] sm:$0xf]  ;;  %v3083_v25 = vor.u32 %v4456_v18, %v3080_v19 }
  0x3c   :  { %v3638_v28 = vld [vmem:[#allocation5 + $0x4e0] sm:$0xf]  ;;  %v4598_v29 = vld [vmem:[#allocation5 + $0x4ec] sm:$0xf0]  ;;  %v3399_v41 = vor.u32 %v4538_v27, %v3398_v26  ;;  %1337 = vmatpush.bf16.msra.mxu1 %v3143_v36  ;;  %v3208_v23 = vld [vmem:[#allocation5 + $0x190] sm:$0xf0] }
  0x3d   :  { %v3766_v30 = vld [vmem:[#allocation5 + $0x5e0] sm:$0xf]  ;;  %v4630_v31 = vld [vmem:[#allocation5 + $0x5ec] sm:$0xf0]  ;;  %v3639_v42 = vor.u32 %v4598_v29, %v3638_v28  ;;  %1350 = vmatpush.bf16.msra.mxu2 %v3271_v37  ;;  %v119_v32 = vld [vmem:[#allocation2 + $0x30] sm:$0xff]  ;;  %v3211_v33 = vor.u32 %v4488_v22, %v3208_v23 }
  0x3e   :  { %v3782_v38 = vld [vmem:[#allocation5 + $0x600] sm:$0xf]  ;;  %v4634_v39 = vld [vmem:[#allocation5 + $0x60c] sm:$0xf0]  ;;  %v3767_v46 = vor.u32 %v4630_v31, %v3766_v30  ;;  %1363 = vmatpush.bf16.msra.mxu3 %v3399_v41  ;;  %1325 = vmatmul.bf16.vlgmr.msra.gmra.mxu0 %v5051_v55  ;;  %v4452_v30 = vld [vmem:[#allocation5 + $0x64] sm:$0xf] }
  0x3f   :  { %v116_v45 = vld [vmem:[#allocation2 + $0x18] sm:$0xff]  ;;  %v4594_v49 = vld [vmem:[#allocation5 + $0x4cc] sm:$0xf0]  ;;  %v3783_v56 = vor.u32 %v4634_v39, %v3782_v38  ;;  %1369 = vmatpush.bf16.msrb.mxu0 %v3639_v42  ;;  %v3064_v31 = vld [vmem:[#allocation5 + $0x70] sm:$0xf0] }
  0x40   :  { %v3622_v48 = vld [vmem:[#allocation5 + $0x4c0] sm:$0xf]  ;;  %v4626_v52 = vld [vmem:[#allocation5 + $0x5cc] sm:$0xf0]  ;;  %v5053_v57 = vpack.c.bf16 %v116_v45, %v116_v45  ;;  %1382 = vmatpush.bf16.msrb.mxu1 %v3767_v46  ;;  %1351 = vmatmul.bf16.vlgmr.msra.gmra.mxu2 %v5049_v51  ;;  %v3192_v36 = vld [vmem:[#allocation5 + $0x170] sm:$0xf0]  ;;  %v3067_v38 = vor.u32 %v4452_v30, %v3064_v31  ;;  %v5061_v45 = vpack.c.bf16 %v119_v32, %v119_v32 }
  0x41   :  { %v3750_v50 = vld [vmem:[#allocation5 + $0x5c0] sm:$0xf]  ;;  %v114_v58 = vld [vmem:[#allocation2 + $0x8] sm:$0xff]  ;;  %v3623_v60 = vor.u32 %v4594_v49, %v3622_v48  ;;  %1402 = vmatpush.bf16.msrb.mxu2 %v3783_v56  ;;  %v3195_v46 = vor.u32 %v4484_v35, %v3192_v36  ;;  %v4480_v48 = vld [vmem:[#allocation5 + $0x144] sm:$0xf] }
  0x42   :  { %1408 = vmatpush.bf16.msrb.mxu3 %v3131_v47  ;;  %v3751_v63 = vor.u32 %v4626_v52, %v3750_v50  ;;  %v3606_v1 = vld [vmem:[#allocation5 + $0x4a0] sm:$0xf]  ;;  %v4590_v2 = vld [vmem:[#allocation5 + $0x4ac] sm:$0xf0]  ;;  %v5057_v7 = vpack.c.bf16 %v114_v58, %v114_v58  ;;  %v3176_v49 = vld [vmem:[#allocation5 + $0x150] sm:$0xf0]  ;;  %v3051_v52 = vor.u32 %v4448_v43, %v3048_v44 }
  0x43   :  { %v3734_v3 = vld [vmem:[#allocation5 + $0x5a0] sm:$0xf]  ;;  %v4622_v4 = vld [vmem:[#allocation5 + $0x5ac] sm:$0xf0]  ;;  %1364 = vmatmul.bf16.vlgmr.msra.gmra.mxu3 %v5053_v57  ;;  %1370 = vmatpush.bf16.msrb.mxu0 %v3623_v60  ;;  %v3607_v9 = vor.u32 %v4590_v2, %v3606_v1  ;;  %v3032_v60 = vld [vmem:[#allocation5 + $0x30] sm:$0xf0]  ;;  %v3179_v61 = vor.u32 %v4480_v48, %v3176_v49 }
  0x44   :  { %1383 = vmatpush.bf16.msrb.mxu1 %v3751_v63  ;;  %v3735_v12 = vor.u32 %v4622_v4, %v3734_v3  ;;  %v3590_v14 = vld [vmem:[#allocation5 + $0x480] sm:$0xf]  ;;  %v4586_v15 = vld [vmem:[#allocation5 + $0x48c] sm:$0xf0]  ;;  %v4476_v63 = vld [vmem:[#allocation5 + $0x124] sm:$0xf] }
  0x45   :  { %1421 = vmatpush.bf16.msra.mxu2 %v3259_v59  ;;  %v3718_v16 = vld [vmem:[#allocation5 + $0x580] sm:$0xf]  ;;  %1338 = vmatmul.bf16.vlgmr.msra.gmra.mxu1 %v5057_v7  ;;  %v4618_v17 = vld [vmem:[#allocation5 + $0x58c] sm:$0xf0]  ;;  %v3591_v21 = vor.u32 %v4586_v15, %v3590_v14  ;;  %v4444_v59 = vld [vmem:[#allocation5 + $0x24] sm:$0xf] }
  0x46   :  { %1409 = vmatpush.bf16.msrb.mxu3 %v3115_v0  ;;  %v3719_v24 = vor.u32 %v4618_v17, %v3718_v16  ;;  %v3574_v26 = vld [vmem:[#allocation5 + $0x460] sm:$0xf]  ;;  %v4582_v27 = vld [vmem:[#allocation5 + $0x46c] sm:$0xf0]  ;;  %v3160_v0 = vld [vmem:[#allocation5 + $0x130] sm:$0xf0]  ;;  %v3035_v3 = vor.u32 %v4444_v59, %v3032_v60 }
  0x47   :  { %1371 = vmatpush.bf16.msrb.mxu0 %v3607_v9  ;;  %v3702_v28 = vld [vmem:[#allocation5 + $0x560] sm:$0xf]  ;;  %v4614_v29 = vld [vmem:[#allocation5 + $0x56c] sm:$0xf0]  ;;  %v3575_v34 = vor.u32 %v4582_v27, %v3574_v26  ;;  %v3016_v9 = vld [vmem:[#allocation5 + $0x10] sm:$0xf0]  ;;  %v3163_v14 = vor.u32 %v4476_v63, %v3160_v0 }
  0x48   :  { %1384 = vmatpush.bf16.msrb.mxu1 %v3735_v12  ;;  %v3703_v37 = vor.u32 %v4614_v29, %v3702_v28  ;;  %v3558_v39 = vld [vmem:[#allocation5 + $0x440] sm:$0xf]  ;;  %v4578_v40 = vld [vmem:[#allocation5 + $0x44c] sm:$0xf0]  ;;  %v4532_v10 = vld [vmem:[#allocation5 + $0x2e4] sm:$0xf] }
  0x49   :  { %1422 = vmatpush.bf16.msra.mxu2 %v3243_v8  ;;  %v3686_v41 = vld [vmem:[#allocation5 + $0x540] sm:$0xf]  ;;  %v4610_v42 = vld [vmem:[#allocation5 + $0x54c] sm:$0xf0]  ;;  %v3559_v47 = vor.u32 %v4578_v40, %v3558_v39  ;;  %v4440_v8 = vld [vmem:[#allocation5 + $0x4] sm:$0xf] }
  0x4a   :  { %1410 = vmatpush.bf16.msrb.mxu3 %v3099_v13  ;;  %v3687_v50 = vor.u32 %v4610_v42, %v3686_v41  ;;  %v3542_v53 = vld [vmem:[#allocation5 + $0x420] sm:$0xf]  ;;  %v4574_v54 = vld [vmem:[#allocation5 + $0x42c] sm:$0xf0]  ;;  %v3384_v11 = vld [vmem:[#allocation5 + $0x2f0] sm:$0xf0] }
  0x4b   :  { %1372 = vmatpush.bf16.msrb.mxu0 %v3591_v21  ;;  %v3670_v56 = vld [vmem:[#allocation5 + $0x520] sm:$0xf]  ;;  %v4606_v58 = vld [vmem:[#allocation5 + $0x52c] sm:$0xf0]  ;;  %v3543_v62 = vor.u32 %v4574_v54, %v3542_v53  ;;  %v4564_v12 = vld [vmem:[#allocation5 + $0x3e4] sm:$0xf] }
  0x4c   :  { %1385 = vmatpush.bf16.msrb.mxu1 %v3719_v24  ;;  %v3526_v1 = vld [vmem:[#allocation5 + $0x400] sm:$0xf]  ;;  %v3671_v2 = vor.u32 %v4606_v58, %v3670_v56  ;;  %v4570_v4 = vld [vmem:[#allocation5 + $0x40c] sm:$0xf0]  ;;  %v3512_v13 = vld [vmem:[#allocation5 + $0x3f0] sm:$0xf0]  ;;  %v3387_v24 = vor.u32 %v4532_v10, %v3384_v11 }
  0x4d   :  { %1423 = vmatpush.bf16.msra.mxu2 %v3227_v20  ;;  %v3654_v5 = vld [vmem:[#allocation5 + $0x500] sm:$0xf]  ;;  %v4602_v6 = vld [vmem:[#allocation5 + $0x50c] sm:$0xf0]  ;;  %v3527_v15 = vor.u32 %v4570_v4, %v3526_v1  ;;  %v4596_v16 = vld [vmem:[#allocation5 + $0x4e4] sm:$0xf]  ;;  %v3019_v20 = vor.u32 %v4440_v8, %v3016_v9 }
  0x4e   :  { %1411 = vmatpush.bf16.msrb.mxu3 %v3083_v25  ;;  %v3640_v17 = vld [vmem:[#allocation5 + $0x4f0] sm:$0xf0]  ;;  %v117_v18 = vld [vmem:[#allocation2 + $0x20] sm:$0xff]  ;;  %v3655_v19 = vor.u32 %v4602_v6, %v3654_v5  ;;  %v4472_v21 = vld [vmem:[#allocation5 + $0x104] sm:$0xf]  ;;  %v3515_v25 = vor.u32 %v4564_v12, %v3512_v13 }
  0x4f   :  { %1373 = vmatpush.bf16.msrb.mxu0 %v3575_v34  ;;  %v3144_v22 = vld [vmem:[#allocation5 + $0x110] sm:$0xf0]  ;;  %v4628_v26 = vld [vmem:[#allocation5 + $0x5e4] sm:$0xf]  ;;  %v3643_v29 = vor.u32 %v4596_v16, %v3640_v17  ;;  %v5065_v30 = vpack.c.bf16 %v117_v18, %v117_v18 }
  0x50   :  { %1386 = vmatpush.bf16.msrb.mxu1 %v3703_v37  ;;  %3796 = vmatmul.msk.bf16.vlgmr.msrb.gmra.mxu2 %vm1313_vm0, %v5061_v45  ;;  %v118_v23 = vld [vmem:[#allocation2 + $0x28] sm:$0xff]  ;;  %v4528_v28 = vld [vmem:[#allocation5 + $0x2c4] sm:$0xf]  ;;  %v3147_v34 = vor.u32 %v4472_v21, %v3144_v22 }
  0x51   :  { %1424 = vmatpush.bf16.msra.mxu2 %v3211_v33  ;;  %v3768_v27 = vld [vmem:[#allocation5 + $0x5f0] sm:$0xf0]  ;;  %v4560_v32 = vld [vmem:[#allocation5 + $0x3c4] sm:$0xf]  ;;  %v5067_v35 = vpack.c.bf16 %v118_v23, %v118_v23 }
  0x52   :  { %1412 = vmatpush.bf16.msrb.mxu3 %v3067_v38  ;;  %v3368_v31 = vld [vmem:[#allocation5 + $0x2d0] sm:$0xf0]  ;;  %v4592_v36 = vld [vmem:[#allocation5 + $0x4c4] sm:$0xf]  ;;  %v3771_v38 = vor.u32 %v4628_v26, %v3768_v27 }
  0x53   :  { %1374 = vmatpush.bf16.msrb.mxu0 %v3559_v47  ;;  %v3496_v33 = vld [vmem:[#allocation5 + $0x3d0] sm:$0xf0]  ;;  %v3371_v39 = vor.u32 %v4528_v28, %v3368_v31  ;;  %v4624_v41 = vld [vmem:[#allocation5 + $0x5c4] sm:$0xf] }
  0x54   :  { %1387 = vmatpush.bf16.msrb.mxu1 %v3687_v50  ;;  %v3624_v37 = vld [vmem:[#allocation5 + $0x4d0] sm:$0xf0]  ;;  %v3499_v40 = vor.u32 %v4560_v32, %v3496_v33  ;;  %v4524_v43 = vld [vmem:[#allocation5 + $0x2a4] sm:$0xf] }
  0x55   :  { %1425 = vmatpush.bf16.msra.mxu2 %v3195_v46  ;;  %v3752_v42 = vld [vmem:[#allocation5 + $0x5d0] sm:$0xf0]  ;;  %v3627_v44 = vor.u32 %v4592_v36, %v3624_v37  ;;  %v4556_v47 = vld [vmem:[#allocation5 + $0x3a4] sm:$0xf] }
  0x56   :  { %1413 = vmatpush.bf16.msrb.mxu3 %v3051_v52  ;;  %v3352_v46 = vld [vmem:[#allocation5 + $0x2b0] sm:$0xf0]  ;;  %v4588_v49 = vld [vmem:[#allocation5 + $0x4a4] sm:$0xf]  ;;  %v3755_v52 = vor.u32 %v4624_v41, %v3752_v42 }
  0x57   :  { %1375 = vmatpush.bf16.msrb.mxu0 %v3543_v62  ;;  %v3480_v48 = vld [vmem:[#allocation5 + $0x3b0] sm:$0xf0]  ;;  %v3355_v53 = vor.u32 %v4524_v43, %v3352_v46  ;;  %v4620_v56 = vld [vmem:[#allocation5 + $0x5a4] sm:$0xf] }
  0x58   :  { %1388 = vmatpush.bf16.msrb.mxu1 %v3671_v2  ;;  %v3608_v50 = vld [vmem:[#allocation5 + $0x4b0] sm:$0xf0]  ;;  %v3483_v54 = vor.u32 %v4556_v47, %v3480_v48  ;;  %v4520_v59 = vld [vmem:[#allocation5 + $0x284] sm:$0xf] }
  0x59   :  { %1426 = vmatpush.bf16.msra.mxu2 %v3179_v61  ;;  %v3736_v58 = vld [vmem:[#allocation5 + $0x5b0] sm:$0xf0]  ;;  %v3611_v60 = vor.u32 %v4588_v49, %v3608_v50  ;;  %v4552_v62 = vld [vmem:[#allocation5 + $0x384] sm:$0xf] }
  0x5a   :  { %1414 = vmatpush.bf16.msrb.mxu3 %v3035_v3  ;;  %v3336_v61 = vld [vmem:[#allocation5 + $0x290] sm:$0xf0]  ;;  %v4584_v0 = vld [vmem:[#allocation5 + $0x484] sm:$0xf]  ;;  %v3739_v2 = vor.u32 %v4620_v56, %v3736_v58  ;;  %v3134_v56 = vld [vmem:[#allocation5 + $0xe8] sm:$0xf] }
  0x5b   :  { %1376 = vmatpush.bf16.msrb.mxu0 %v3527_v15  ;;  %v3464_v63 = vld [vmem:[#allocation5 + $0x390] sm:$0xf0]  ;;  %v3339_v3 = vor.u32 %v4520_v59, %v3336_v61  ;;  %v4616_v5 = vld [vmem:[#allocation5 + $0x584] sm:$0xf]  ;;  %v4471_v58 = vld [vmem:[#allocation5 + $0xf4] sm:$0xf0] }
  0x5c   :  { %1389 = vmatpush.bf16.msrb.mxu1 %v3655_v19  ;;  %v3592_v1 = vld [vmem:[#allocation5 + $0x490] sm:$0xf0]  ;;  %v3467_v4 = vor.u32 %v4552_v62, %v3464_v63  ;;  %v4516_v8 = vld [vmem:[#allocation5 + $0x264] sm:$0xf]  ;;  %v3390_v62 = vld [vmem:[#allocation5 + $0x2e8] sm:$0xf] }
  0x5d   :  { %1427 = vmatpush.bf16.msra.mxu2 %v3163_v14  ;;  %v3720_v6 = vld [vmem:[#allocation5 + $0x590] sm:$0xf0]  ;;  %v3595_v9 = vor.u32 %v4584_v0, %v3592_v1  ;;  %v4548_v11 = vld [vmem:[#allocation5 + $0x364] sm:$0xf]  ;;  %v4535_v63 = vld [vmem:[#allocation5 + $0x2f4] sm:$0xf0] }
  0x5e   :  { %1415 = vmatpush.bf16.msrb.mxu3 %v3019_v20  ;;  %1377 = vmatmul.bf16.vlgmr.msrb.gmra.mxu0 %v5065_v30  ;;  %v3320_v10 = vld [vmem:[#allocation5 + $0x270] sm:$0xf0]  ;;  %v4580_v13 = vld [vmem:[#allocation5 + $0x464] sm:$0xf]  ;;  %v3723_v15 = vor.u32 %v4616_v5, %v3720_v6  ;;  %v3135_v5 = vor.u32 %v4471_v58, %v3134_v56  ;;  %v3518_v6 = vld [vmem:[#allocation5 + $0x3e8] sm:$0xf] }
  0x5f   :  { %1434 = vmatpush.bf16.msra.mxu0 %v3387_v24  ;;  %1390 = vmatmul.bf16.vlgmr.msrb.gmra.mxu1 %v5067_v35  ;;  %v3448_v12 = vld [vmem:[#allocation5 + $0x370] sm:$0xf0]  ;;  %v3323_v16 = vor.u32 %v4516_v8, %v3320_v10  ;;  %v4612_v18 = vld [vmem:[#allocation5 + $0x564] sm:$0xf]  ;;  %v4567_v8 = vld [vmem:[#allocation5 + $0x3f4] sm:$0xf0] }
  0x60   :  { %1447 = vmatpush.bf16.msra.mxu1 %v3515_v25  ;;  %v3576_v14 = vld [vmem:[#allocation5 + $0x470] sm:$0xf0]  ;;  %v3451_v17 = vor.u32 %v4548_v11, %v3448_v12  ;;  %v4512_v20 = vld [vmem:[#allocation5 + $0x244] sm:$0xf]  ;;  %v3262_v10 = vld [vmem:[#allocation5 + $0x1e8] sm:$0xf]  ;;  %v3391_v12 = vor.u32 %v4535_v63, %v3390_v62 }
  0x61   :  { %1428 = vmatpush.bf16.msra.mxu2 %v3147_v34  ;;  %1416 = vmatmul.bf16.vlgmr.msrb.gmra.mxu3 %v5051_v55  ;;  %v3704_v19 = vld [vmem:[#allocation5 + $0x570] sm:$0xf0]  ;;  %v3579_v21 = vor.u32 %v4580_v13, %v3576_v14  ;;  %v4544_v23 = vld [vmem:[#allocation5 + $0x344] sm:$0xf]  ;;  %v4503_v11 = vld [vmem:[#allocation5 + $0x1f4] sm:$0xf0] }
  0x62   :  { %1460 = vmatpush.bf16.msra.mxu3 %v3643_v29  ;;  %v3304_v22 = vld [vmem:[#allocation5 + $0x250] sm:$0xf0]  ;;  %v4576_v25 = vld [vmem:[#allocation5 + $0x444] sm:$0xf]  ;;  %v3707_v27 = vor.u32 %v4612_v18, %v3704_v19  ;;  %v3118_v14 = vld [vmem:[#allocation5 + $0xc8] sm:$0xf]  ;;  %v3263_v19 = vor.u32 %v4503_v11, %v3262_v10 }
  0x63   :  { %1435 = vmatpush.bf16.msra.mxu0 %v3371_v39  ;;  %v3432_v24 = vld [vmem:[#allocation5 + $0x350] sm:$0xf0]  ;;  %v3307_v28 = vor.u32 %v4512_v20, %v3304_v22  ;;  %v4608_v31 = vld [vmem:[#allocation5 + $0x544] sm:$0xf]  ;;  %v4531_v18 = vld [vmem:[#allocation5 + $0x2d4] sm:$0xf0] }
  0x64   :  { %1448 = vmatpush.bf16.msra.mxu1 %v3499_v40  ;;  %1429 = vmatmul.bf16.vlgmr.msra.gmra.mxu2 %v5057_v7  ;;  %v3560_v26 = vld [vmem:[#allocation5 + $0x450] sm:$0xf0]  ;;  %v3435_v29 = vor.u32 %v4544_v23, %v3432_v24  ;;  %v4508_v33 = vld [vmem:[#allocation5 + $0x224] sm:$0xf]  ;;  %v3502_v20 = vld [vmem:[#allocation5 + $0x3c8] sm:$0xf] }
  0x65   :  { %1473 = vmatpush.bf16.msrb.mxu2 %v3771_v38  ;;  %v3688_v32 = vld [vmem:[#allocation5 + $0x550] sm:$0xf0]  ;;  %v3563_v34 = vor.u32 %v4576_v25, %v3560_v26  ;;  %v4540_v37 = vld [vmem:[#allocation5 + $0x324] sm:$0xf]  ;;  %v3246_v23 = vld [vmem:[#allocation5 + $0x1c8] sm:$0xf] }
  0x66   :  { %1461 = vmatpush.bf16.msra.mxu3 %v3627_v44  ;;  %v3288_v36 = vld [vmem:[#allocation5 + $0x230] sm:$0xf0]  ;;  %v4572_v39 = vld [vmem:[#allocation5 + $0x424] sm:$0xf]  ;;  %v3691_v41 = vor.u32 %v4608_v31, %v3688_v32  ;;  %v4499_v24 = vld [vmem:[#allocation5 + $0x1d4] sm:$0xf0] }
  0x67   :  { %1436 = vmatpush.bf16.msra.mxu0 %v3355_v53  ;;  %v3416_v38 = vld [vmem:[#allocation5 + $0x330] sm:$0xf0]  ;;  %v4604_v42 = vld [vmem:[#allocation5 + $0x524] sm:$0xf]  ;;  %v3291_v44 = vor.u32 %v4508_v33, %v3288_v36  ;;  %v3102_v26 = vld [vmem:[#allocation5 + $0xa8] sm:$0xf]  ;;  %v3247_v32 = vor.u32 %v4499_v24, %v3246_v23 }
  0x68   :  { %1449 = vmatpush.bf16.msra.mxu1 %v3483_v54  ;;  %v3544_v40 = vld [vmem:[#allocation5 + $0x430] sm:$0xf0]  ;;  %v3419_v46 = vor.u32 %v4540_v37, %v3416_v38  ;;  %v4504_v47 = vld [vmem:[#allocation5 + $0x204] sm:$0xf]  ;;  %v4527_v31 = vld [vmem:[#allocation5 + $0x2b4] sm:$0xf0] }
  0x69   :  { %1474 = vmatpush.bf16.msrb.mxu2 %v3755_v52  ;;  %v3672_v43 = vld [vmem:[#allocation5 + $0x530] sm:$0xf0]  ;;  %v4536_v49 = vld [vmem:[#allocation5 + $0x304] sm:$0xf]  ;;  %v3547_v50 = vor.u32 %v4572_v39, %v3544_v40  ;;  %v3486_v33 = vld [vmem:[#allocation5 + $0x3a8] sm:$0xf] }
  0x6a   :  { %1462 = vmatpush.bf16.msra.mxu3 %v3611_v60  ;;  %v3272_v48 = vld [vmem:[#allocation5 + $0x210] sm:$0xf0]  ;;  %v4568_v53 = vld [vmem:[#allocation5 + $0x404] sm:$0xf]  ;;  %v3675_v60 = vor.u32 %v4604_v42, %v3672_v43  ;;  %v3230_v37 = vld [vmem:[#allocation5 + $0x1a8] sm:$0xf] }
  0x6b   :  { %1437 = vmatpush.bf16.msra.mxu0 %v3339_v3  ;;  %v3400_v52 = vld [vmem:[#allocation5 + $0x310] sm:$0xf0]  ;;  %v4632_v59 = vld [vmem:[#allocation5 + $0x604] sm:$0xf]  ;;  %v3275_v0 = vor.u32 %v4504_v47, %v3272_v48  ;;  %v4495_v38 = vld [vmem:[#allocation5 + $0x1b4] sm:$0xf0] }
  0x6c   :  { %1450 = vmatpush.bf16.msra.mxu1 %v3467_v4  ;;  %v3528_v54 = vld [vmem:[#allocation5 + $0x410] sm:$0xf0]  ;;  %v3403_v1 = vor.u32 %v4536_v49, %v3400_v52  ;;  %v3086_v40 = vld [vmem:[#allocation5 + $0x88] sm:$0xf]  ;;  %v4555_v48 = vld [vmem:[#allocation5 + $0x394] sm:$0xf0] }
  0x6d   :  { %1475 = vmatpush.bf16.msrb.mxu2 %v3739_v2  ;;  %v3784_v61 = vld [vmem:[#allocation5 + $0x610] sm:$0xf0]  ;;  %v4600_v2 = vld [vmem:[#allocation5 + $0x504] sm:$0xf]  ;;  %v3531_v4 = vor.u32 %v4568_v53, %v3528_v54  ;;  %v3342_v43 = vld [vmem:[#allocation5 + $0x288] sm:$0xf] }
  0x6e   :  { %1463 = vmatpush.bf16.msra.mxu3 %v3595_v9  ;;  %v3656_v3 = vld [vmem:[#allocation5 + $0x510] sm:$0xf0]  ;;  %v3787_v9 = vor.u32 %v4632_v59, %v3784_v61  ;;  %v3470_v47 = vld [vmem:[#allocation5 + $0x388] sm:$0xf]  ;;  %v4491_v52 = vld [vmem:[#allocation5 + $0x194] sm:$0xf0] }
  0x6f   :  { %1438 = vmatpush.bf16.msra.mxu0 %v3323_v16  ;;  %v3659_v13 = vor.u32 %v4600_v2, %v3656_v3  ;;  %v3519_v16 = vor.u32 %v4567_v8, %v3518_v6  ;;  %v3070_v54 = vld [vmem:[#allocation5 + $0x68] sm:$0xf]  ;;  %v4455_v56 = vld [vmem:[#allocation5 + $0x74] sm:$0xf0]  ;;  %v3471_v58 = vor.u32 %v4555_v48, %v3470_v47  ;;  %v4469_v47 = vld [vmem:[#allocation5 + $0xec] sm:$0xf] }
  0x70   :  { %1451 = vmatpush.bf16.msra.mxu1 %v3451_v17  ;;  %v3374_v17 = vld [vmem:[#allocation5 + $0x2c8] sm:$0xf]  ;;  %v4551_v63 = vld [vmem:[#allocation5 + $0x374] sm:$0xf0]  ;;  %v3136_v48 = vld [vmem:[#allocation5 + $0xf8] sm:$0xf0] }
  0x71   :  { %1476 = vmatpush.bf16.msrb.mxu2 %v3723_v15  ;;  %v4467_v15 = vld [vmem:[#allocation5 + $0xd4] sm:$0xf0]  ;;  %v3375_v25 = vor.u32 %v4531_v18, %v3374_v17  ;;  %v3326_v59 = vld [vmem:[#allocation5 + $0x268] sm:$0xf] }
  0x72   :  { %1464 = vmatpush.bf16.msra.mxu3 %v3579_v21  ;;  %v4563_v21 = vld [vmem:[#allocation5 + $0x3d4] sm:$0xf0]  ;;  %v3119_v22 = vor.u32 %v4467_v15, %v3118_v14  ;;  %v3454_v62 = vld [vmem:[#allocation5 + $0x368] sm:$0xf] }
  0x73   :  { %1439 = vmatpush.bf16.msra.mxu0 %v3307_v28  ;;  %v3503_v28 = vor.u32 %v4563_v21, %v3502_v20  ;;  %v4487_v2 = vld [vmem:[#allocation5 + $0x174] sm:$0xf0]  ;;  %v3455_v6 = vor.u32 %v4551_v63, %v3454_v62  ;;  %v3310_v8 = vld [vmem:[#allocation5 + $0x248] sm:$0xf]  ;;  %v3139_v63 = vor.u32 %v4469_v47, %v3136_v48 }
  0x74   :  { %1452 = vmatpush.bf16.msra.mxu1 %v3435_v29  ;;  %v3358_v29 = vld [vmem:[#allocation5 + $0x2a8] sm:$0xf]  ;;  %v4483_v15 = vld [vmem:[#allocation5 + $0x154] sm:$0xf0] }
  0x75   :  { %1477 = vmatpush.bf16.msrb.mxu2 %v3707_v27  ;;  %v4463_v27 = vld [vmem:[#allocation5 + $0xb4] sm:$0xf0]  ;;  %v3359_v39 = vor.u32 %v4527_v31, %v3358_v29  ;;  %v3438_v11 = vld [vmem:[#allocation5 + $0x348] sm:$0xf] }
  0x76   :  { %1465 = vmatpush.bf16.msra.mxu3 %v3563_v34  ;;  %v4559_v34 = vld [vmem:[#allocation5 + $0x3b4] sm:$0xf0]  ;;  %v3103_v36 = vor.u32 %v4463_v27, %v3102_v26  ;;  %v3182_v14 = vld [vmem:[#allocation5 + $0x148] sm:$0xf] }
  0x77   :  { %1440 = vmatpush.bf16.msra.mxu0 %v3291_v44  ;;  %v3487_v42 = vor.u32 %v4559_v34, %v3486_v33  ;;  %v4523_v44 = vld [vmem:[#allocation5 + $0x294] sm:$0xf0]  ;;  %v3038_v17 = vld [vmem:[#allocation5 + $0x28] sm:$0xf] }
  0x78   :  { %1453 = vmatpush.bf16.msra.mxu1 %v3419_v46  ;;  %v3231_v46 = vor.u32 %v4495_v38, %v3230_v37  ;;  %v3343_v53 = vor.u32 %v4523_v44, %v3342_v43  ;;  %v4447_v18 = vld [vmem:[#allocation5 + $0x34] sm:$0xf0]  ;;  %v3294_v20 = vld [vmem:[#allocation5 + $0x228] sm:$0xf] }
  0x79   :  { %1478 = vmatpush.bf16.msrb.mxu2 %v3691_v41  ;;  %v4459_v41 = vld [vmem:[#allocation5 + $0x94] sm:$0xf0]  ;;  %v3422_v23 = vld [vmem:[#allocation5 + $0x328] sm:$0xf] }
  0x7a   :  { %1466 = vmatpush.bf16.msra.mxu3 %v3547_v50  ;;  %v3087_v49 = vor.u32 %v4459_v41, %v3086_v40  ;;  %v3214_v50 = vld [vmem:[#allocation5 + $0x188] sm:$0xf]  ;;  %v4511_v21 = vld [vmem:[#allocation5 + $0x234] sm:$0xf0] }
  0x7b   :  { %1441 = vmatpush.bf16.msra.mxu0 %v3275_v0  ;;  %v3215_v61 = vor.u32 %v4491_v52, %v3214_v50  ;;  %v3071_v0 = vor.u32 %v4455_v56, %v3070_v54  ;;  %v4543_v24 = vld [vmem:[#allocation5 + $0x334] sm:$0xf0]  ;;  %v3166_v26 = vld [vmem:[#allocation5 + $0x128] sm:$0xf]  ;;  %v3295_v29 = vor.u32 %v4511_v21, %v3294_v20 }
  0x7c   :  { %1454 = vmatpush.bf16.msra.mxu1 %v3403_v1  ;;  %v3198_v1 = vld [vmem:[#allocation5 + $0x168] sm:$0xf]  ;;  %v4479_v27 = vld [vmem:[#allocation5 + $0x134] sm:$0xf0]  ;;  %v3423_v34 = vor.u32 %v4543_v24, %v3422_v23  ;;  %v3232_v23 = vld [vmem:[#allocation5 + $0x1b8] sm:$0xf0] }
  0x7d   :  { %1479 = vmatpush.bf16.msrb.mxu2 %v3675_v60  ;;  %v4519_v60 = vld [vmem:[#allocation5 + $0x274] sm:$0xf0]  ;;  %v3199_v10 = vor.u32 %v4487_v2, %v3198_v1  ;;  %v3278_v37 = vld [vmem:[#allocation5 + $0x208] sm:$0xf]  ;;  %v3167_v40 = vor.u32 %v4479_v27, %v3166_v26  ;;  %v4465_v1 = vld [vmem:[#allocation5 + $0xcc] sm:$0xf] }
  0x7e   :  { %1467 = vmatpush.bf16.msra.mxu3 %v3531_v4  ;;  %1442 = vmatmul.bf16.vlgmr.msra.gmra.mxu0 %v5049_v51  ;;  %v3327_v3 = vor.u32 %v4519_v60, %v3326_v59  ;;  %v3054_v4 = vld [vmem:[#allocation5 + $0x48] sm:$0xf]  ;;  %v4443_v31 = vld [vmem:[#allocation5 + $0x14] sm:$0xf0]  ;;  %v4501_v60 = vld [vmem:[#allocation5 + $0x1ec] sm:$0xf] }
  0x7f   :  { %1525 = vmatpush.bf16.msrb.mxu0 %v3391_v12  ;;  %1455 = vmatmul.bf16.vlgmr.msra.gmra.mxu1 %v5053_v57  ;;  %v4547_v12 = vld [vmem:[#allocation5 + $0x354] sm:$0xf0]  ;;  %v3774_v52 = vld [vmem:[#allocation5 + $0x5e8] sm:$0xf]  ;;  %v3120_v2 = vld [vmem:[#allocation5 + $0xd8] sm:$0xf0] }
  0x80   :  { %1499 = vmatpush.bf16.msrb.mxu1 %v3135_v5  ;;  %v4451_v5 = vld [vmem:[#allocation5 + $0x54] sm:$0xf0]  ;;  %v3630_v54 = vld [vmem:[#allocation5 + $0x4c8] sm:$0xf]  ;;  %v4457_v26 = vld [vmem:[#allocation5 + $0x8c] sm:$0xf] }
  0x81   :  { %1480 = vmatpush.bf16.msrb.mxu2 %v3659_v13  ;;  %1468 = vmatmul.bf16.vlgmr.msra.gmra.mxu3 %v5065_v30  ;;  %v3055_v13 = vor.u32 %v4451_v5, %v3054_v4  ;;  %v4599_v33 = vld [vmem:[#allocation5 + $0x4f4] sm:$0xf0]  ;;  %v3758_v5 = vld [vmem:[#allocation5 + $0x5c8] sm:$0xf]  ;;  %v3088_v27 = vld [vmem:[#allocation5 + $0x98] sm:$0xf0] }
  0x82   :  { %1493 = vmatpush.bf16.msrb.mxu3 %v3787_v9  ;;  %v4515_v9 = vld [vmem:[#allocation5 + $0x254] sm:$0xf0]  ;;  %v3598_v20 = vld [vmem:[#allocation5 + $0x488] sm:$0xf] }
  0x83   :  { %1526 = vmatpush.bf16.msrb.mxu0 %v3375_v25  ;;  %v3039_v25 = vor.u32 %v4447_v18, %v3038_v17  ;;  %v4507_v38 = vld [vmem:[#allocation5 + $0x214] sm:$0xf0]  ;;  %v3742_v18 = vld [vmem:[#allocation5 + $0x5a8] sm:$0xf] }
  0x84   :  { %1500 = vmatpush.bf16.msrb.mxu1 %v3119_v22  ;;  %1481 = vmatmul.bf16.vlgmr.msrb.gmra.mxu2 %v5067_v35  ;;  %v3183_v22 = vor.u32 %v4483_v15, %v3182_v14  ;;  %v4539_v41 = vld [vmem:[#allocation5 + $0x314] sm:$0xf0]  ;;  %v3279_v50 = vor.u32 %v4507_v38, %v3278_v37  ;;  %v4461_v14 = vld [vmem:[#allocation5 + $0xac] sm:$0xf]  ;;  %v3104_v15 = vld [vmem:[#allocation5 + $0xb8] sm:$0xf0]  ;;  %v3091_v38 = vor.u32 %v4457_v26, %v3088_v27 }
  0x85   :  { %1538 = vmatpush.bf16.msra.mxu2 %v3519_v16  ;;  %v3311_v16 = vor.u32 %v4515_v9, %v3310_v8  ;;  %v4635_v43 = vld [vmem:[#allocation5 + $0x614] sm:$0xf0]  ;;  %v3614_v8 = vld [vmem:[#allocation5 + $0x4a8] sm:$0xf]  ;;  %v3107_v24 = vor.u32 %v4461_v14, %v3104_v15  ;;  %v3216_v37 = vld [vmem:[#allocation5 + $0x198] sm:$0xf0] }
  0x86   :  { %1512 = vmatpush.bf16.msra.mxu3 %v3263_v19  ;;  %v3439_v19 = vor.u32 %v4547_v12, %v3438_v11  ;;  %v4591_v9 = vld [vmem:[#allocation5 + $0x4b4] sm:$0xf0]  ;;  %v3248_v11 = vld [vmem:[#allocation5 + $0x1d8] sm:$0xf0]  ;;  %v3123_v12 = vor.u32 %v4465_v1, %v3120_v2  ;;  %v3566_v47 = vld [vmem:[#allocation5 + $0x448] sm:$0xf] }
  0x87   :  { %1527 = vmatpush.bf16.msrb.mxu0 %v3359_v39  ;;  %v3406_v39 = vld [vmem:[#allocation5 + $0x308] sm:$0xf]  ;;  %v4587_v21 = vld [vmem:[#allocation5 + $0x494] sm:$0xf0]  ;;  %v3184_v1 = vld [vmem:[#allocation5 + $0x158] sm:$0xf0] }
  0x88   :  { %1501 = vmatpush.bf16.msrb.mxu1 %v3103_v36  ;;  %v3150_v36 = vld [vmem:[#allocation5 + $0x108] sm:$0xf]  ;;  %v3407_v56 = vor.u32 %v4539_v41, %v3406_v39  ;;  %v3072_v41 = vld [vmem:[#allocation5 + $0x78] sm:$0xf0]  ;;  %v4579_v48 = vld [vmem:[#allocation5 + $0x454] sm:$0xf0] }
  0x89   :  { %1539 = vmatpush.bf16.msra.mxu2 %v3503_v28  ;;  %v3022_v28 = vld [vmem:[#allocation5 + $0x8] sm:$0xf]  ;;  %v3168_v14 = vld [vmem:[#allocation5 + $0x138] sm:$0xf0] }
  0x8a   :  { %1513 = vmatpush.bf16.msra.mxu3 %v3247_v32  ;;  %v3646_v32 = vld [vmem:[#allocation5 + $0x4e8] sm:$0xf]  ;;  %v3023_v44 = vor.u32 %v4443_v31, %v3022_v28  ;;  %v3599_v28 = vor.u32 %v4587_v21, %v3598_v20  ;;  %v4441_v20 = vld [vmem:[#allocation5 + $0xc] sm:$0xf]  ;;  %v3024_v21 = vld [vmem:[#allocation5 + $0x18] sm:$0xf0] }
  0x8b   :  { %1528 = vmatpush.bf16.msrb.mxu0 %v3343_v53  ;;  %v4631_v53 = vld [vmem:[#allocation5 + $0x5f4] sm:$0xf0]  ;;  %v3726_v31 = vld [vmem:[#allocation5 + $0x588] sm:$0xf]  ;;  %v3520_v26 = vld [vmem:[#allocation5 + $0x3f8] sm:$0xf0] }
  0x8c   :  { %1502 = vmatpush.bf16.msrb.mxu1 %v3087_v49  ;;  %v3647_v49 = vor.u32 %v4599_v33, %v3646_v32  ;;  %v4619_v32 = vld [vmem:[#allocation5 + $0x594] sm:$0xf0]  ;;  %v3582_v33 = vld [vmem:[#allocation5 + $0x468] sm:$0xf] }
  0x8d   :  { %1540 = vmatpush.bf16.msra.mxu2 %v3487_v42  ;;  %v3790_v42 = vld [vmem:[#allocation5 + $0x608] sm:$0xf]  ;;  %v3727_v39 = vor.u32 %v4619_v32, %v3726_v31  ;;  %v4529_v31 = vld [vmem:[#allocation5 + $0x2cc] sm:$0xf]  ;;  %v3027_v32 = vor.u32 %v4441_v20, %v3024_v21 }
  0x8e   :  { %1514 = vmatpush.bf16.msra.mxu3 %v3231_v46  ;;  %v4475_v46 = vld [vmem:[#allocation5 + $0x114] sm:$0xf0]  ;;  %v3791_v59 = vor.u32 %v4635_v43, %v3790_v42  ;;  %v4549_v20 = vld [vmem:[#allocation5 + $0x36c] sm:$0xf] }
  0x8f   :  { %1529 = vmatpush.bf16.msrb.mxu0 %v3327_v3  ;;  %v3151_v62 = vor.u32 %v4475_v46, %v3150_v36  ;;  %v4489_v36 = vld [vmem:[#allocation5 + $0x18c] sm:$0xf]  ;;  %v4615_v46 = vld [vmem:[#allocation5 + $0x574] sm:$0xf0] }
  0x90   :  { %1503 = vmatpush.bf16.msrb.mxu1 %v3071_v0  ;;  %v3775_v0 = vor.u32 %v4631_v53, %v3774_v52  ;;  %v3219_v43 = vor.u32 %v4489_v36, %v3216_v37  ;;  %v3152_v36 = vld [vmem:[#allocation5 + $0x118] sm:$0xf0] }
  0x91   :  { %1541 = vmatpush.bf16.msra.mxu2 %v3471_v58  ;;  %3797 = vmatmul.msk.bf16.vlgmr.msrb.gmra.mxu3 %vm1313_vm0, %v5061_v45  ;;  %v4595_v58 = vld [vmem:[#allocation5 + $0x4d4] sm:$0xf0] }
  0x92   :  { %1515 = vmatpush.bf16.msra.mxu3 %v3215_v61  ;;  %v3264_v61 = vld [vmem:[#allocation5 + $0x1f8] sm:$0xf0]  ;;  %v3631_v3 = vor.u32 %v4595_v58, %v3630_v54  ;;  %v4449_v54 = vld [vmem:[#allocation5 + $0x4c] sm:$0xf]  ;;  %v3567_v58 = vor.u32 %v4579_v48, %v3566_v47 }
  0x93   :  { %1530 = vmatpush.bf16.msrb.mxu0 %v3311_v16  ;;  %v3267_v4 = vor.u32 %v4501_v60, %v3264_v61  ;;  %v3615_v16 = vor.u32 %v4591_v9, %v3614_v8  ;;  %v3694_v60 = vld [vmem:[#allocation5 + $0x548] sm:$0xf]  ;;  %v4611_v61 = vld [vmem:[#allocation5 + $0x554] sm:$0xf0]  ;;  %v4593_v47 = vld [vmem:[#allocation5 + $0x4cc] sm:$0xf] }
  0x94   :  { %1504 = vmatpush.bf16.msrb.mxu1 %v3055_v13  ;;  %v3678_v9 = vld [vmem:[#allocation5 + $0x528] sm:$0xf]  ;;  %v3632_v48 = vld [vmem:[#allocation5 + $0x4d8] sm:$0xf0] }
  0x95   :  { %1542 = vmatpush.bf16.msra.mxu2 %v3455_v6  ;;  %v4627_v6 = vld [vmem:[#allocation5 + $0x5d4] sm:$0xf0] }
  0x96   :  { %1516 = vmatpush.bf16.msra.mxu3 %v3199_v10  ;;  %v4497_v10 = vld [vmem:[#allocation5 + $0x1cc] sm:$0xf]  ;;  %v3759_v13 = vor.u32 %v4627_v6, %v3758_v5  ;;  %v3040_v5 = vld [vmem:[#allocation5 + $0x38] sm:$0xf0] }
  0x97   :  { %1531 = vmatpush.bf16.msrb.mxu0 %v3295_v29  ;;  %v3251_v17 = vor.u32 %v4497_v10, %v3248_v11  ;;  %v4607_v10 = vld [vmem:[#allocation5 + $0x534] sm:$0xf0]  ;;  %v3534_v11 = vld [vmem:[#allocation5 + $0x408] sm:$0xf] }
  0x98   :  { %1505 = vmatpush.bf16.msrb.mxu1 %v3039_v25 }
  0x99   :  { %1543 = vmatpush.bf16.msra.mxu2 %v3439_v19  ;;  %v4623_v19 = vld [vmem:[#allocation5 + $0x5b4] sm:$0xf0] }
  0x9a   :  { %1517 = vmatpush.bf16.msra.mxu3 %v3183_v22  ;;  %v4493_v22 = vld [vmem:[#allocation5 + $0x1ac] sm:$0xf]  ;;  %v3743_v25 = vor.u32 %v4623_v19, %v3742_v18  ;;  %v3679_v18 = vor.u32 %v4607_v10, %v3678_v9  ;;  %v3662_v19 = vld [vmem:[#allocation5 + $0x508] sm:$0xf]  ;;  %v3472_v10 = vld [vmem:[#allocation5 + $0x398] sm:$0xf0] }
  0x9b   :  { %1532 = vmatpush.bf16.msrb.mxu0 %v3279_v50  ;;  %v3235_v29 = vor.u32 %v4493_v22, %v3232_v23  ;;  %v3200_v50 = vld [vmem:[#allocation5 + $0x178] sm:$0xf0] }
  0x9c   :  { %1506 = vmatpush.bf16.msrb.mxu1 %v3023_v44  ;;  %v3710_v44 = vld [vmem:[#allocation5 + $0x568] sm:$0xf] }
  0x9d   :  { %1544 = vmatpush.bf16.msra.mxu2 %v3423_v34  ;;  %v4583_v34 = vld [vmem:[#allocation5 + $0x474] sm:$0xf0]  ;;  %v3711_v53 = vor.u32 %v4615_v46, %v3710_v44  ;;  %v3504_v46 = vld [vmem:[#allocation5 + $0x3d8] sm:$0xf0] }
  0x9e   :  { %1518 = vmatpush.bf16.msra.mxu3 %v3167_v40  ;;  %1533 = vmatmul.bf16.vlgmr.msrb.gmra.mxu0 %v5049_v51  ;;  %v4453_v40 = vld [vmem:[#allocation5 + $0x6c] sm:$0xf]  ;;  %v3583_v42 = vor.u32 %v4583_v34, %v3582_v33  ;;  %v3376_v33 = vld [vmem:[#allocation5 + $0x2d8] sm:$0xf0] }
  0x9f   :  { %1584 = vmatpush.bf16.msra.mxu0 %v3791_v59  ;;  %1507 = vmatmul.bf16.vlgmr.msrb.gmra.mxu1 %v5051_v55  ;;  %v3075_v52 = vor.u32 %v4453_v40, %v3072_v41  ;;  %v4473_v34 = vld [vmem:[#allocation5 + $0x10c] sm:$0xf] }
  0xa0   :  { %1551 = vmatpush.bf16.msra.mxu1 %v3647_v49  ;;  %v4485_v49 = vld [vmem:[#allocation5 + $0x16c] sm:$0xf]  ;;  %v3155_v44 = vor.u32 %v4473_v34, %v3152_v36 }
  0xa1   :  { %1545 = vmatpush.bf16.msra.mxu2 %v3407_v56  ;;  %v3056_v56 = vld [vmem:[#allocation5 + $0x58] sm:$0xf0]  ;;  %v3203_v59 = vor.u32 %v4485_v49, %v3200_v50  ;;  %v4525_v50 = vld [vmem:[#allocation5 + $0x2ac] sm:$0xf] }
  0xa2   :  { %1519 = vmatpush.bf16.msra.mxu3 %v3151_v62  ;;  %v3550_v62 = vld [vmem:[#allocation5 + $0x428] sm:$0xf]  ;;  %v3059_v2 = vor.u32 %v4449_v54, %v3056_v56  ;;  %v3760_v54 = vld [vmem:[#allocation5 + $0x5d8] sm:$0xf0]  ;;  %v4545_v34 = vld [vmem:[#allocation5 + $0x34c] sm:$0xf] }
  0xa3   :  { %1603 = vmatpush.bf16.msrb.mxu0 %v3267_v4  ;;  %v4445_v4 = vld [vmem:[#allocation5 + $0x2c] sm:$0xf] }
  0xa4   :  { %1552 = vmatpush.bf16.msra.mxu1 %v3631_v3  ;;  %1546 = vmatmul.bf16.vlgmr.msra.gmra.mxu2 %v5053_v57  ;;  %v3695_v3 = vor.u32 %v4611_v61, %v3694_v60  ;;  %v3043_v15 = vor.u32 %v4445_v4, %v3040_v5  ;;  %v3488_v61 = vld [vmem:[#allocation5 + $0x3b8] sm:$0xf0] }
  0xa5   :  { %1590 = vmatpush.bf16.msrb.mxu2 %v3139_v63  ;;  %1520 = vmatmul.bf16.vlgmr.msra.gmra.mxu3 %v5057_v7  ;;  %v4575_v63 = vld [vmem:[#allocation5 + $0x434] sm:$0xf0]  ;;  %v3744_v4 = vld [vmem:[#allocation5 + $0x5b8] sm:$0xf0] }
  0xa6   :  { %1564 = vmatpush.bf16.msrb.mxu3 %v3775_v0  ;;  %v4481_v0 = vld [vmem:[#allocation5 + $0x14c] sm:$0xf]  ;;  %v3551_v6 = vor.u32 %v4575_v63, %v3550_v62  ;;  %v3616_v63 = vld [vmem:[#allocation5 + $0x4b8] sm:$0xf0] }
  0xa7   :  { %1604 = vmatpush.bf16.msrb.mxu0 %v3251_v17  ;;  %v3187_v8 = vor.u32 %v4481_v0, %v3184_v1  ;;  %v3392_v17 = vld [vmem:[#allocation5 + $0x2f8] sm:$0xf0]  ;;  %v4589_v62 = vld [vmem:[#allocation5 + $0x4ac] sm:$0xf] }
  0xa8   :  { %1553 = vmatpush.bf16.msra.mxu1 %v3615_v16  ;;  %v4533_v16 = vld [vmem:[#allocation5 + $0x2ec] sm:$0xf] }
  0xa9   :  { %1591 = vmatpush.bf16.msrb.mxu2 %v3123_v12  ;;  %v4571_v12 = vld [vmem:[#allocation5 + $0x414] sm:$0xf0]  ;;  %v3395_v27 = vor.u32 %v4533_v16, %v3392_v17  ;;  %v4521_v1 = vld [vmem:[#allocation5 + $0x28c] sm:$0xf]  ;;  %v3728_v17 = vld [vmem:[#allocation5 + $0x598] sm:$0xf0] }
  0xaa   :  { %1565 = vmatpush.bf16.msrb.mxu3 %v3759_v13  ;;  %v4477_v13 = vld [vmem:[#allocation5 + $0x12c] sm:$0xf]  ;;  %v3535_v22 = vor.u32 %v4571_v12, %v3534_v11  ;;  %v3600_v12 = vld [vmem:[#allocation5 + $0x498] sm:$0xf0] }
  0xab   :  { %1605 = vmatpush.bf16.msrb.mxu0 %v3235_v29  ;;  %v3171_v23 = vor.u32 %v4477_v13, %v3168_v14  ;;  %v3648_v29 = vld [vmem:[#allocation5 + $0x4f8] sm:$0xf0]  ;;  %v4585_v11 = vld [vmem:[#allocation5 + $0x48c] sm:$0xf] }
  0xac   :  { %1554 = vmatpush.bf16.msra.mxu1 %v3599_v28  ;;  %v4597_v28 = vld [vmem:[#allocation5 + $0x4ec] sm:$0xf] }
  0xad   :  { %1592 = vmatpush.bf16.msrb.mxu2 %v3107_v24  ;;  %v4603_v24 = vld [vmem:[#allocation5 + $0x514] sm:$0xf0]  ;;  %v3651_v41 = vor.u32 %v4597_v28, %v3648_v29  ;;  %v4517_v14 = vld [vmem:[#allocation5 + $0x26c] sm:$0xf]  ;;  %v3712_v29 = vld [vmem:[#allocation5 + $0x578] sm:$0xf0] }
  0xae   :  { %1566 = vmatpush.bf16.msrb.mxu3 %v3743_v25  ;;  %3798 = vmatmul.msk.bf16.vlgmr.msra.gmra.mxu0 %vm1313_vm0, %v5061_v45  ;;  %v4565_v25 = vld [vmem:[#allocation5 + $0x3ec] sm:$0xf]  ;;  %v3663_v37 = vor.u32 %v4603_v24, %v3662_v19  ;;  %v3603_v19 = vor.u32 %v4585_v11, %v3600_v12  ;;  %v3584_v24 = vld [vmem:[#allocation5 + $0x478] sm:$0xf0] }
  0xaf   :  { %1606 = vmatpush.bf16.msrb.mxu0 %v3219_v43  ;;  %v3523_v40 = vor.u32 %v4565_v25, %v3520_v26  ;;  %v3379_v43 = vor.u32 %v4529_v31, %v3376_v33  ;;  %v4513_v26 = vld [vmem:[#allocation5 + $0x24c] sm:$0xf]  ;;  %v3536_v11 = vld [vmem:[#allocation5 + $0x418] sm:$0xf0] }
  0xb0   :  { %1555 = vmatpush.bf16.msra.mxu1 %v3583_v42  ;;  %v4561_v42 = vld [vmem:[#allocation5 + $0x3cc] sm:$0xf] }
  0xb1   :  { %1593 = vmatpush.bf16.msrb.mxu2 %v3091_v38  ;;  %v4629_v38 = vld [vmem:[#allocation5 + $0x5ec] sm:$0xf]  ;;  %v3507_v56 = vor.u32 %v4561_v42, %v3504_v46 }
  0xb2   :  { %1567 = vmatpush.bf16.msrb.mxu3 %v3727_v39  ;;  %v3776_v39 = vld [vmem:[#allocation5 + $0x5f8] sm:$0xf0]  ;;  %v4613_v28 = vld [vmem:[#allocation5 + $0x56c] sm:$0xf] }
  0xb3   :  { %1607 = vmatpush.bf16.msrb.mxu0 %v3203_v59  ;;  %v3779_v49 = vor.u32 %v4629_v38, %v3776_v39  ;;  %v4557_v59 = vld [vmem:[#allocation5 + $0x3ac] sm:$0xf]  ;;  %v3440_v38 = vld [vmem:[#allocation5 + $0x358] sm:$0xf0] }
  0xb4   :  { %1556 = vmatpush.bf16.msra.mxu1 %v3567_v58  ;;  %v3635_v58 = vor.u32 %v4593_v47, %v3632_v48  ;;  %v3491_v5 = vor.u32 %v4557_v59, %v3488_v61  ;;  %v4577_v39 = vld [vmem:[#allocation5 + $0x44c] sm:$0xf]  ;;  %v3696_v47 = vld [vmem:[#allocation5 + $0x558] sm:$0xf0]  ;;  %v3443_v48 = vor.u32 %v4545_v34, %v3440_v38  ;;  %v3882_v38 = vld [vmem:[#allocation8 + $0xa0] sm:$0xf] }
  0xb5   :  { %1594 = vmatpush.bf16.msrb.mxu2 %v3075_v52  ;;  %v3360_v52 = vld [vmem:[#allocation5 + $0x2b8] sm:$0xf0]  ;;  %v4509_v42 = vld [vmem:[#allocation5 + $0x22c] sm:$0xf] }
  0xb6   :  { %1568 = vmatpush.bf16.msrb.mxu3 %v3711_v53  ;;  %v4625_v53 = vld [vmem:[#allocation5 + $0x5cc] sm:$0xf]  ;;  %v3363_v60 = vor.u32 %v4525_v50, %v3360_v52 }
  0xb7   :  { %1608 = vmatpush.bf16.msrb.mxu0 %v3187_v8  ;;  %v3763_v0 = vor.u32 %v4625_v53, %v3760_v54  ;;  %v4553_v8 = vld [vmem:[#allocation5 + $0x38c] sm:$0xf]  ;;  %v3424_v53 = vld [vmem:[#allocation5 + $0x338] sm:$0xf0] }
  0xb8   :  { %1557 = vmatpush.bf16.msra.mxu1 %v3551_v6  ;;  %v3619_v6 = vor.u32 %v4589_v62, %v3616_v63  ;;  %v4609_v46 = vld [vmem:[#allocation5 + $0x54c] sm:$0xf]  ;;  %v3680_v63 = vld [vmem:[#allocation5 + $0x538] sm:$0xf0] }
  0xb9   :  { %1595 = vmatpush.bf16.msrb.mxu2 %v3059_v2  ;;  %v3344_v2 = vld [vmem:[#allocation5 + $0x298] sm:$0xf0]  ;;  %v4541_v50 = vld [vmem:[#allocation5 + $0x32c] sm:$0xf] }
  0xba   :  { %1569 = vmatpush.bf16.msrb.mxu3 %v3695_v3  ;;  %v4621_v3 = vld [vmem:[#allocation5 + $0x5ac] sm:$0xf]  ;;  %v3347_v9 = vor.u32 %v4521_v1, %v3344_v2  ;;  %v3792_v1 = vld [vmem:[#allocation5 + $0x618] sm:$0xf0]  ;;  %v5097_v2 = vld [vmem:[#allocation7] sm:$0xf] }
  0xbb   :  { %1609 = vmatpush.bf16.msrb.mxu0 %v3171_v23  ;;  %v3747_v13 = vor.u32 %v4621_v3, %v3744_v4  ;;  %v5089_v16 = vpop.f32.mrf.mxu0  ;;  %v4581_v23 = vld [vmem:[#allocation5 + $0x46c] sm:$0xf]  ;;  %v3427_v4 = vor.u32 %v4541_v50, %v3424_v53 }
  0xbc   :  { %1558 = vmatpush.bf16.msra.mxu1 %v3535_v22  ;;  %v3456_v22 = vld [vmem:[#allocation5 + $0x378] sm:$0xf0]  ;;  %v3587_v33 = vor.u32 %v4581_v23, %v3584_v24  ;;  %v4573_v54 = vld [vmem:[#allocation5 + $0x42c] sm:$0xf] }
  0xbd   :  { %1596 = vmatpush.bf16.msrb.mxu2 %v3043_v15  ;;  %v3328_v15 = vld [vmem:[#allocation5 + $0x278] sm:$0xf0]  ;;  %v4505_v59 = vld [vmem:[#allocation5 + $0x20c] sm:$0xf] }
  0xbe   :  { %1570 = vmatpush.bf16.msrb.mxu3 %v3679_v18  ;;  %v3475_v18 = vor.u32 %v4553_v8, %v3472_v10  ;;  %v3331_v21 = vor.u32 %v4517_v14, %v3328_v15  ;;  %v4605_v61 = vld [vmem:[#allocation5 + $0x52c] sm:$0xf]  ;;  %v3914_v14 = vld [vmem:[#allocation8 + $0xe0] sm:$0xf]  ;;  %v4666_v15 = vld [vmem:[#allocation8 + $0xec] sm:$0xf0] }
  0xbf   :  { %1559 = vmatmul.bf16.vlgmr.msra.gmra.mxu1 %v5065_v30  ;;  %1610 = vmatpush.bf16.msrb.mxu0 %v3155_v44  ;;  %v4569_v10 = vld [vmem:[#allocation5 + $0x40c] sm:$0xf]  ;;  %v3915_v24 = vor.u32 %v4666_v15, %v3914_v14  ;;  %v3802_v14 = vld [vmem:[#allocation8] sm:$0xf]  ;;  %v4638_v15 = vld [vmem:[#allocation8 + $0xc] sm:$0xf0] }
  0xc0   :  { %1616 = vmatpush.bf16.msrb.mxu1 %v3395_v27  ;;  %v3312_v27 = vld [vmem:[#allocation5 + $0x258] sm:$0xf0]  ;;  %v3539_v23 = vor.u32 %v4569_v10, %v3536_v11  ;;  %v3946_v11 = vld [vmem:[#allocation8 + $0x120] sm:$0xf] }
  0xc1   :  { %1597 = vmatpush.bf16.msrb.mxu2 %v3027_v32  ;;  %v3459_v32 = vor.u32 %v4549_v20, %v3456_v22  ;;  %v3315_v36 = vor.u32 %v4513_v26, %v3312_v27  ;;  %v4698_v20 = vld [vmem:[#allocation8 + $0x1ec] sm:$0xf0]  ;;  %v3898_v26 = vld [vmem:[#allocation8 + $0xc0] sm:$0xf] }
  0xc2   :  { %1571 = vmatpush.bf16.msrb.mxu3 %v3663_v37  ;;  %1611 = vmatmul.bf16.vlgmr.msrb.gmra.mxu0 %v5057_v7  ;;  %v5091_v25 = vpop.f32.mrf.mxu1  ;;  %v4662_v27 = vld [vmem:[#allocation8 + $0xcc] sm:$0xf0] }
  0xc3   :  { %1655 = vmatpush.bf16.msra.mxu0 %v3779_v49  ;;  %v5093_v31 = vpop.f32.mrf.mxu2  ;;  %v1328_v44 = vpop.f32.mrf.mxu0 }
  0xc4   :  { %1617 = vmatpush.bf16.msrb.mxu1 %v3379_v43  ;;  %1598 = vmatmul.bf16.vlgmr.msrb.gmra.mxu2 %v5051_v55  ;;  %v4617_v55 = vld [vmem:[#allocation5 + $0x58c] sm:$0xf]  ;;  %v3296_v43 = vld [vmem:[#allocation5 + $0x238] sm:$0xf0]  ;;  %v4654_v44 = vld [vmem:[#allocation8 + $0x8c] sm:$0xf0] }
  0xc5   :  { %1642 = vmatpush.bf16.msra.mxu2 %v3651_v41  ;;  %1572 = vmatmul.bf16.vlgmr.msrb.gmra.mxu3 %v5067_v35  ;;  %v3731_v7 = vor.u32 %v4617_v55, %v3728_v17  ;;  %v3715_v41 = vor.u32 %v4613_v28, %v3712_v29  ;;  %v3299_v52 = vor.u32 %v4509_v42, %v3296_v43  ;;  %v4601_v55 = vld [vmem:[#allocation5 + $0x50c] sm:$0xf]  ;;  %v4026_v29 = vld [vmem:[#allocation8 + $0x1c0] sm:$0xf]  ;;  %v4690_v42 = vld [vmem:[#allocation8 + $0x1ac] sm:$0xf0] }
  0xc6   :  { %1629 = vmatpush.bf16.msra.mxu3 %v3523_v40  ;;  %v5095_v37 = vpop.f32.mrf.mxu3  ;;  %v3568_v40 = vld [vmem:[#allocation5 + $0x458] sm:$0xf0] }
  0xc7   :  { %1656 = vmatpush.bf16.msra.mxu0 %v3763_v0  ;;  %v3571_v49 = vor.u32 %v4577_v39, %v3568_v40  ;;  %v4633_v0 = vld [vmem:[#allocation5 + $0x60c] sm:$0xf]  ;;  %v4658_v39 = vld [vmem:[#allocation8 + $0xac] sm:$0xf0] }
  0xc8   :  { %1618 = vmatpush.bf16.msrb.mxu1 %v3363_v60  ;;  %v3280_v60 = vld [vmem:[#allocation5 + $0x218] sm:$0xf0]  ;;  %v3795_v17 = vor.u32 %v4633_v0, %v3792_v1  ;;  %v3962_v0 = vld [vmem:[#allocation8 + $0x140] sm:$0xf]  ;;  %v4678_v1 = vld [vmem:[#allocation8 + $0x14c] sm:$0xf0] }
  0xc9   :  { %1643 = vmatpush.bf16.msra.mxu2 %v3635_v58  ;;  %v3699_v58 = vor.u32 %v4609_v46, %v3696_v47  ;;  %v3283_v8 = vor.u32 %v4505_v59, %v3280_v60  ;;  %v3963_v10 = vor.u32 %v4678_v1, %v3962_v0  ;;  %v4714_v0 = vld [vmem:[#allocation8 + $0x26c] sm:$0xf0]  ;;  %v326_v1 = vperm.slane %v5097_v2, 1 }
  0xca   :  { %1630 = vmatpush.bf16.msra.mxu3 %v3507_v56  ;;  %v3552_v56 = vld [vmem:[#allocation5 + $0x438] sm:$0xf0]  ;;  %v1341_v62 = vpop.f32.mrf.mxu1 }
  0xcb   :  { %1657 = vmatpush.bf16.msra.mxu0 %v3747_v13  ;;  %v1354_v3 = vpop.f32.mrf.mxu2  ;;  %v3683_v13 = vor.u32 %v4605_v61, %v3680_v63  ;;  %v3834_v61 = vld [vmem:[#allocation8 + $0x40] sm:$0xf]  ;;  %v4646_v62 = vld [vmem:[#allocation8 + $0x4c] sm:$0xf0] }
  0xcc   :  { %1619 = vmatpush.bf16.msrb.mxu1 %v3347_v9  ;;  %v3408_v9 = vld [vmem:[#allocation5 + $0x318] sm:$0xf0] }
  0xcd   :  { %1644 = vmatpush.bf16.msra.mxu2 %v3619_v6  ;;  %v4537_v6 = vld [vmem:[#allocation5 + $0x30c] sm:$0xf] }
  0xce   :  { %1631 = vmatpush.bf16.msra.mxu3 %v3491_v5  ;;  %v3555_v5 = vor.u32 %v4573_v54, %v3552_v56  ;;  %v1367_v12 = vpop.f32.mrf.mxu3  ;;  %v3411_v22 = vor.u32 %v4537_v6, %v3408_v9  ;;  %v4650_v54 = vld [vmem:[#allocation8 + $0x6c] sm:$0xf0]  ;;  %v3978_v56 = vld [vmem:[#allocation8 + $0x160] sm:$0xf] }
  0xcf   :  { %1658 = vmatpush.bf16.msra.mxu0 %v3731_v7  ;;  %v4642_v9 = vld [vmem:[#allocation8 + $0x2c] sm:$0xf0] }
  0xd0   :  { %1620 = vmatpush.bf16.msrb.mxu1 %v3331_v21  ;;  %v325_v21 = vperm.slane %v5097_v2, 0  ;;  %v4674_v12 = vld [vmem:[#allocation8 + $0x12c] sm:$0xf0] }
  0xd1   :  { %1645 = vmatpush.bf16.msra.mxu2 %v3603_v19  ;;  %v4042_v19 = vld [vmem:[#allocation8 + $0x1e0] sm:$0xf] }
  0xd2   :  { %1632 = vmatpush.bf16.msra.mxu3 %v3475_v18  ;;  %v3664_v18 = vld [vmem:[#allocation5 + $0x518] sm:$0xf0]  ;;  %v4043_v28 = vor.u32 %v4698_v20, %v4042_v19  ;;  %v4730_v19 = vld [vmem:[#allocation8 + $0x2ec] sm:$0xf0] }
  0xd3   :  { %1659 = vmatpush.bf16.msra.mxu0 %v3715_v41  ;;  %v3667_v7 = vor.u32 %v4601_v55, %v3664_v18  ;;  %v5102_v34 = vpop.f32.mrf.mxu2  ;;  %v4010_v41 = vld [vmem:[#allocation8 + $0x1a0] sm:$0xf] }
  0xd4   :  { %1621 = vmatpush.bf16.msrb.mxu1 %v3315_v36  ;;  %v3899_v36 = vor.u32 %v4662_v27, %v3898_v26  ;;  %v4011_v46 = vor.u32 %v4690_v42, %v4010_v41  ;;  %v4170_v18 = vld [vmem:[#allocation8 + $0x2e0] sm:$0xf]  ;;  %v4044_v26 = vld [vmem:[#allocation8 + $0x1f0] sm:$0xf0]  ;;  %v3803_v27 = vor.u32 %v4638_v15, %v3802_v14  ;;  %v4692_v42 = vld [vmem:[#allocation8 + $0x1c4] sm:$0xf] }
  0xd5   :  { %1646 = vmatpush.bf16.msra.mxu2 %v3587_v33  ;;  %v1327_v33 = vadd.f32 %v5089_v16, %v325_v21  ;;  %v3866_v16 = vld [vmem:[#allocation8 + $0x80] sm:$0xf]  ;;  %v3916_v21 = vld [vmem:[#allocation8 + $0xf0] sm:$0xf0]  ;;  %v4644_v15 = vld [vmem:[#allocation8 + $0x44] sm:$0xf] }
  0xd6   :  { %1633 = vmatpush.bf16.msra.mxu3 %v3459_v32  ;;  %v4694_v32 = vld [vmem:[#allocation8 + $0x1cc] sm:$0xf0]  ;;  %v3867_v53 = vor.u32 %v4654_v44, %v3866_v16  ;;  %v4138_v44 = vld [vmem:[#allocation8 + $0x2a0] sm:$0xf] }
  0xd7   :  { %1660 = vmatpush.bf16.msra.mxu0 %v3699_v58  ;;  %v4027_v40 = vor.u32 %v4694_v32, %v4026_v29  ;;  %v1340_v43 = vadd.f32 %v5091_v25, %v1327_v33  ;;  %v3850_v25 = vld [vmem:[#allocation8 + $0x60] sm:$0xf] }
  0xd8   :  { %1622 = vmatpush.bf16.msrb.mxu1 %v3299_v52  ;;  %v3851_v59 = vor.u32 %v4650_v54, %v3850_v25  ;;  %v4122_v25 = vld [vmem:[#allocation8 + $0x280] sm:$0xf]  ;;  %v4718_v54 = vld [vmem:[#allocation8 + $0x28c] sm:$0xf0] }
  0xd9   :  { %1647 = vmatpush.bf16.msra.mxu2 %v3571_v49  ;;  %v4686_v49 = vld [vmem:[#allocation8 + $0x18c] sm:$0xf0]  ;;  %v1353_v50 = vadd.f32 %v5093_v31, %v1340_v43  ;;  %v4028_v43 = vld [vmem:[#allocation8 + $0x1d0] sm:$0xf0] }
  0xda   :  { %1634 = vmatpush.bf16.msra.mxu3 %v3443_v48  ;;  %v3994_v48 = vld [vmem:[#allocation8 + $0x180] sm:$0xf] }
  0xdb   :  { %1661 = vmatpush.bf16.msra.mxu0 %v3683_v13  ;;  %v1378_v47 = vpop.f32.mrf.mxu0  ;;  %v1406_v52 = vpop.f32.mrf.mxu2  ;;  %v1366_v58 = vadd.f32 %v5095_v37, %v1353_v50 }
  0xdc   :  { %1623 = vmatpush.bf16.msrb.mxu1 %v3283_v8  ;;  %v3818_v8 = vld [vmem:[#allocation8 + $0x20] sm:$0xf]  ;;  %v4012_v52 = vld [vmem:[#allocation8 + $0x1b0] sm:$0xf0] }
  0xdd   :  { %1648 = vmatpush.bf16.msra.mxu2 %v3555_v5  ;;  %v1379_v60 = vadd.f32 %v1378_v47, %v1366_v58  ;;  %v3835_v5 = vor.u32 %v4646_v62, %v3834_v61  ;;  %v3819_v13 = vor.u32 %v4642_v9, %v3818_v8  ;;  %v4656_v47 = vld [vmem:[#allocation8 + $0xa4] sm:$0xf]  ;;  %v4123_v58 = vor.u32 %v4718_v54, %v4122_v25 }
  0xde   :  { %1635 = vmatpush.bf16.msra.mxu3 %v3427_v4  ;;  %v4680_v9 = vld [vmem:[#allocation8 + $0x164] sm:$0xf] }
  0xdf   :  { %1624 = vmatmul.bf16.vlgmr.msrb.gmra.mxu1 %v5049_v51  ;;  %1662 = vmatpush.bf16.msra.mxu0 %v3667_v7  ;;  %v3883_v51 = vor.u32 %v4658_v39, %v3882_v38  ;;  %v4696_v7 = vld [vmem:[#allocation8 + $0x1e4] sm:$0xf]  ;;  %v3900_v39 = vld [vmem:[#allocation8 + $0xd0] sm:$0xf0] }
  0xe0   :  { %1675 = vmatpush.bf16.msra.mxu1 %v3795_v17  ;;  %v3947_v17 = vor.u32 %v4674_v12, %v3946_v11  ;;  %v4660_v38 = vld [vmem:[#allocation8 + $0xc4] sm:$0xf]  ;;  %v4090_v12 = vld [vmem:[#allocation8 + $0x240] sm:$0xf] }
  0xe1   :  { %1649 = vmatpush.bf16.msra.mxu2 %v3539_v23  ;;  %v4670_v23 = vld [vmem:[#allocation8 + $0x10c] sm:$0xf0]  ;;  %v3903_v16 = vor.u32 %v4660_v38, %v3900_v39  ;;  %v4636_v38 = vld [vmem:[#allocation8 + $0x4] sm:$0xf] }
  0xe2   :  { %1636 = vmatpush.bf16.msra.mxu3 %v3411_v22  ;;  %1663 = vmatmul.bf16.vlgmr.msra.gmra.mxu0 %v5067_v35  ;;  %v4682_v35 = vld [vmem:[#allocation8 + $0x16c] sm:$0xf0]  ;;  %v3930_v22 = vld [vmem:[#allocation8 + $0x100] sm:$0xf] }
  0xe3   :  { %v3979_v63 = vor.u32 %v4682_v35, %v3978_v56  ;;  %v1380_v3 = vpop.f32.mrf.mxu0  ;;  %v3931_v33 = vor.u32 %v4670_v23, %v3930_v22  ;;  %v3868_v56 = vld [vmem:[#allocation8 + $0x90] sm:$0xf0] }
  0xe4   :  { %2480 = vmatpush.bf16.msrb.mxu1 %v4043_v28  ;;  %1650 = vmatmul.bf16.vlgmr.msra.gmra.mxu2 %v5065_v30  ;;  %v3995_v30 = vor.u32 %v4686_v49, %v3994_v48  ;;  %v5110_v31 = vpop.f32.mrf.mxu3  ;;  %v3884_v48 = vld [vmem:[#allocation8 + $0xb0] sm:$0xf0]  ;;  %v4031_v49 = vor.u32 %v4692_v42, %v4028_v43  ;;  %v4702_v42 = vld [vmem:[#allocation8 + $0x20c] sm:$0xf0]  ;;  %v3922_v43 = vld [vmem:[#allocation8 + $0xe8] sm:$0xf] }
  0xe5   :  { %1637 = vmatmul.bf16.vlgmr.msra.gmra.mxu3 %v5053_v57  ;;  %v1391_v57 = vpop.f32.mrf.mxu1  ;;  %v1418_v14 = vadd.f32 %v5110_v31, %v326_v1 }
  0xe6   :  { %2467 = vmatpush.bf16.msrb.mxu3 %v3915_v24  ;;  %v1392_v37 = vadd.f32 %v1391_v57, %v1379_v60  ;;  %v4171_v24 = vor.u32 %v4730_v19, %v4170_v18  ;;  %v4688_v57 = vld [vmem:[#allocation8 + $0x1a4] sm:$0xf]  ;;  %v3996_v60 = vld [vmem:[#allocation8 + $0x190] sm:$0xf0] }
  0xe7   :  { %v5114_v6 = vpop.f32.mrf.mxu2  ;;  %v4015_v35 = vor.u32 %v4688_v57, %v4012_v52  ;;  %v4676_v19 = vld [vmem:[#allocation8 + $0x144] sm:$0xf] }
  0xe8   :  { %2481 = vmatpush.bf16.msrb.mxu1 %v4027_v40  ;;  %v1405_v55 = vadd.f32 %v5102_v34, %v1392_v37  ;;  %2493 = vmatpush.bf16.msrb.mxu2 %v4171_v24  ;;  %v4154_v34 = vld [vmem:[#allocation8 + $0x2c0] sm:$0xf]  ;;  %v4047_v40 = vor.u32 %v4696_v7, %v4044_v26  ;;  %v4706_v7 = vld [vmem:[#allocation8 + $0x22c] sm:$0xf0]  ;;  %v1431_v26 = vadd.f32 %v5114_v6, %v1418_v14  ;;  %v4050_v14 = vld [vmem:[#allocation8 + $0x1e8] sm:$0xf] }
  0xe9   :  { %v4074_v24 = vld [vmem:[#allocation8 + $0x220] sm:$0xf] }
  0xea   :  { %2468 = vmatpush.bf16.msrb.mxu3 %v3899_v36  ;;  %v1681_v29 = vmax.f32 %v1405_v55, 0.0  ;;  %v4726_v36 = vld [vmem:[#allocation8 + $0x2cc] sm:$0xf0]  ;;  %v3836_v55 = vld [vmem:[#allocation8 + $0x50] sm:$0xf0] }
  0xeb   :  { %v4155_v41 = vor.u32 %v4726_v36, %v4154_v34  ;;  %v3839_v23 = vor.u32 %v4644_v15, %v3836_v55  ;;  %v3948_v34 = vld [vmem:[#allocation8 + $0x130] sm:$0xf0]  ;;  %v4699_v15 = vld [vmem:[#allocation8 + $0x1f4] sm:$0xf0] }
  0xec   :  { %2482 = vmatpush.bf16.msrb.mxu1 %v4011_v46  ;;  %v1419_v20 = vpop.f32.mrf.mxu3  ;;  %v4722_v46 = vld [vmem:[#allocation8 + $0x2ac] sm:$0xf0] }
  0xed   :  { %v1393_v4 = vpop.f32.mrf.mxu1  ;;  %2494 = vmatpush.bf16.msrb.mxu2 %v4155_v41  ;;  %v4139_v50 = vor.u32 %v4722_v46, %v4138_v44  ;;  %v3964_v20 = vld [vmem:[#allocation8 + $0x150] sm:$0xf0]  ;;  %v4058_v41 = vld [vmem:[#allocation8 + $0x200] sm:$0xf]  ;;  %v4728_v44 = vld [vmem:[#allocation8 + $0x2e4] sm:$0xf] }
  0xee   :  { %2469 = vmatpush.bf16.msrb.mxu3 %v3883_v51  ;;  %v5117_v51 = vpack.c.bf16 %v1681_v29, %v1681_v29  ;;  %v4648_v4 = vld [vmem:[#allocation8 + $0x64] sm:$0xf]  ;;  %v3967_v31 = vor.u32 %v4676_v19, %v3964_v20  ;;  %v4059_v6 = vor.u32 %v4702_v42, %v4058_v41  ;;  %v4172_v46 = vld [vmem:[#allocation8 + $0x2f0] sm:$0xf0]  ;;  %v4655_v19 = vld [vmem:[#allocation8 + $0x94] sm:$0xf0] }
  0xef   :  { %3799 = vmatmul.msk.bf16.vlgmr.msra.gmra.mxu1 %vm1313_vm0, %v5061_v45  ;;  %v4664_v45 = vld [vmem:[#allocation8 + $0xe4] sm:$0xf]  ;;  %v1432_v28 = vpop.f32.mrf.mxu2  ;;  %v4175_v57 = vor.u32 %v4728_v44, %v4172_v46  ;;  %v4250_v42 = vld [vmem:[#allocation8 + $0x380] sm:$0xf] }
  0xf0   :  { %2483 = vmatpush.bf16.msrb.mxu1 %v3995_v30  ;;  %v3919_v32 = vor.u32 %v4664_v45, %v3916_v21  ;;  %v4652_v30 = vld [vmem:[#allocation8 + $0x84] sm:$0xf]  ;;  %v3820_v28 = vld [vmem:[#allocation8 + $0x30] sm:$0xf0] }
  0xf1   :  { %2495 = vmatpush.bf16.msrb.mxu2 %v4139_v50  ;;  %v3871_v62 = vor.u32 %v4652_v30, %v3868_v56  ;;  %v3932_v50 = vld [vmem:[#allocation8 + $0x110] sm:$0xf0]  ;;  %v3906_v56 = vld [vmem:[#allocation8 + $0xc8] sm:$0xf]  ;;  %v4716_v20 = vld [vmem:[#allocation8 + $0x284] sm:$0xf] }
  0xf2   :  { %2470 = vmatpush.bf16.msrb.mxu3 %v3867_v53  ;;  %v3887_v53 = vor.u32 %v4656_v47, %v3884_v48  ;;  %v4667_v48 = vld [vmem:[#allocation8 + $0xf4] sm:$0xf0] }
  0xf3   :  { %v3923_v30 = vor.u32 %v4667_v48, %v3922_v43  ;;  %v4750_v43 = vld [vmem:[#allocation8 + $0x38c] sm:$0xf0]  ;;  %v3842_v48 = vld [vmem:[#allocation8 + $0x48] sm:$0xf] }
  0xf4   :  { %2484 = vmatpush.bf16.msrb.mxu1 %v3979_v63  ;;  %v4106_v63 = vld [vmem:[#allocation8 + $0x260] sm:$0xf]  ;;  %v4251_v44 = vor.u32 %v4750_v43, %v4250_v42  ;;  %v4760_v42 = vld [vmem:[#allocation8 + $0x3e4] sm:$0xf]  ;;  %v4300_v43 = vld [vmem:[#allocation8 + $0x3f0] sm:$0xf0] }
  0xf5   :  { %2496 = vmatpush.bf16.msrb.mxu2 %v4123_v58  ;;  %v4107_v8 = vor.u32 %v4714_v0, %v4106_v63  ;;  %v4724_v58 = vld [vmem:[#allocation8 + $0x2c4] sm:$0xf]  ;;  %v4762_v63 = vld [vmem:[#allocation8 + $0x3ec] sm:$0xf0] }
  0xf6   :  { %2471 = vmatpush.bf16.msrb.mxu3 %v3851_v59  ;;  %v4684_v59 = vld [vmem:[#allocation8 + $0x184] sm:$0xf] }
  0xf7   :  { %v3999_v37 = vor.u32 %v4684_v59, %v3996_v60  ;;  %v4156_v59 = vld [vmem:[#allocation8 + $0x2d0] sm:$0xf0]  ;;  %v4663_v60 = vld [vmem:[#allocation8 + $0xd4] sm:$0xf0] }
  0xf8   :  { %2485 = vmatpush.bf16.msrb.mxu1 %v3963_v10  ;;  %v3980_v10 = vld [vmem:[#allocation8 + $0x170] sm:$0xf0] }
  0xf9   :  { %2497 = vmatpush.bf16.msrb.mxu2 %v4107_v8  ;;  %v3983_v45 = vor.u32 %v4680_v9, %v3980_v10  ;;  %v4659_v9 = vld [vmem:[#allocation8 + $0xb4] sm:$0xf0] }
  0xfa   :  { %2472 = vmatpush.bf16.msrb.mxu3 %v3835_v5  ;;  %v3852_v5 = vld [vmem:[#allocation8 + $0x70] sm:$0xf0] }
  0xfb   :  { %v1443_v61 = vpop.f32.mrf.mxu0  ;;  %v3855_v11 = vor.u32 %v4648_v4, %v3852_v5  ;;  %v3890_v4 = vld [vmem:[#allocation8 + $0xa8] sm:$0xf]  ;;  %v4720_v5 = vld [vmem:[#allocation8 + $0x2a4] sm:$0xf] }
  0xfc   :  { %2486 = vmatpush.bf16.msrb.mxu1 %v3947_v17  ;;  %v1456_v3 = vpop.f32.mrf.mxu1  ;;  %v1444_v36 = vadd.f32 %v1443_v61, %v1431_v26  ;;  %v4159_v61 = vor.u32 %v4724_v58, %v4156_v59  ;;  %v4034_v26 = vld [vmem:[#allocation8 + $0x1c8] sm:$0xf] }
  0xfd   :  { %v3826_v59 = vld [vmem:[#allocation8 + $0x28] sm:$0xf] }
  0xfe   :  { %2473 = vmatpush.bf16.msrb.mxu3 %v3819_v13  ;;  %v4710_v13 = vld [vmem:[#allocation8 + $0x24c] sm:$0xf0]  ;;  %v1457_v52 = vadd.f32 %v1456_v3, %v1444_v36  ;;  %v3907_v3 = vor.u32 %v4663_v60, %v3906_v56  ;;  %v4687_v56 = vld [vmem:[#allocation8 + $0x194] sm:$0xf0]  ;;  %v4704_v60 = vld [vmem:[#allocation8 + $0x224] sm:$0xf] }
  0xff   :  { %v4091_v17 = vor.u32 %v4710_v13, %v4090_v12  ;;  %v4758_v12 = vld [vmem:[#allocation8 + $0x3cc] sm:$0xf0] }
 0x100   :  { %2487 = vmatpush.bf16.msrb.mxu1 %v3931_v33  ;;  %v4672_v33 = vld [vmem:[#allocation8 + $0x124] sm:$0xf] }
 0x101   :  { %2498 = vmatpush.bf16.msrb.mxu2 %v4091_v17 }
 0x102   :  { %2474 = vmatpush.bf16.msrb.mxu3 %v3803_v27  ;;  %v4640_v27 = vld [vmem:[#allocation8 + $0x24] sm:$0xf] }
 0x103   :  { %v1445_v21 = vpop.f32.mrf.mxu0  ;;  %v3823_v39 = vor.u32 %v4640_v27, %v3820_v28  ;;  %v4695_v27 = vld [vmem:[#allocation8 + $0x1d4] sm:$0xf0] }
 0x104   :  { %2532 = vmatpush.bf16.msra.mxu1 %v4047_v40  ;;  %v1469_v18 = vpop.f32.mrf.mxu3  ;;  %v1458_v29 = vpop.f32.mrf.mxu1  ;;  %v3804_v40 = vld [vmem:[#allocation8 + $0x10] sm:$0xf0]  ;;  %v4051_v21 = vor.u32 %v4699_v15, %v4050_v14  ;;  %v4639_v14 = vld [vmem:[#allocation8 + $0x14] sm:$0xf0]  ;;  %v4700_v15 = vld [vmem:[#allocation8 + $0x204] sm:$0xf] }
 0x105   :  { %2475 = vmatmul.bf16.vlgmr.msrb.gmra.mxu3 %v5117_v51  ;;  %v1470_v54 = vadd.f32 %v1469_v18, %v1457_v52  ;;  %v3891_v18 = vor.u32 %v4659_v9, %v3890_v4  ;;  %v4647_v52 = vld [vmem:[#allocation8 + $0x54] sm:$0xf0]  ;;  %v4218_v4 = vld [vmem:[#allocation8 + $0x340] sm:$0xf] }
 0x106   :  { %2519 = vmatpush.bf16.msra.mxu3 %v3919_v32  ;;  %v4075_v32 = vor.u32 %v4706_v7, %v4074_v24  ;;  %v4754_v24 = vld [vmem:[#allocation8 + $0x3ac] sm:$0xf0]  ;;  %v3843_v58 = vor.u32 %v4647_v52, %v3842_v48  ;;  %v3892_v52 = vld [vmem:[#allocation8 + $0xb8] sm:$0xf0] }
 0x107   :  { %v1482_v22 = vpop.f32.mrf.mxu2 }
 0x108   :  { %2533 = vmatpush.bf16.msra.mxu1 %v4031_v49  ;;  %2499 = vmatpush.bf16.msrb.mxu2 %v4075_v32  ;;  %v4668_v49 = vld [vmem:[#allocation8 + $0x104] sm:$0xf]  ;;  %v1483_v1 = vadd.f32 %v1482_v22, %v1470_v54  ;;  %v4124_v22 = vld [vmem:[#allocation8 + $0x290] sm:$0xf0]  ;;  %v3858_v32 = vld [vmem:[#allocation8 + $0x68] sm:$0xf] }
 0x109   :  { %v4127_v28 = vor.u32 %v4716_v20, %v4124_v22  ;;  %v4746_v54 = vld [vmem:[#allocation8 + $0x36c] sm:$0xf0]  ;;  %v4665_v22 = vld [vmem:[#allocation8 + $0xec] sm:$0xf] }
 0x10a   :  { %2520 = vmatpush.bf16.msra.mxu3 %v3903_v16  ;;  %v3951_v16 = vor.u32 %v4672_v33, %v3948_v34  ;;  %v4712_v33 = vld [vmem:[#allocation8 + $0x264] sm:$0xf]  ;;  %v4108_v34 = vld [vmem:[#allocation8 + $0x270] sm:$0xf0]  ;;  %v4738_v20 = vld [vmem:[#allocation8 + $0x32c] sm:$0xf0] }
 0x10b   :  { %v4111_v41 = vor.u32 %v4712_v33, %v4108_v34 }
 0x10c   :  { %2534 = vmatpush.bf16.msra.mxu1 %v4015_v35  ;;  %v1471_v47 = vpop.f32.mrf.mxu3  ;;  %2500 = vmatpush.bf16.msrb.mxu2 %v4059_v6  ;;  %v3935_v35 = vor.u32 %v4668_v49, %v3932_v50  ;;  %v4691_v6 = vld [vmem:[#allocation8 + $0x1b4] sm:$0xf0]  ;;  %v4708_v49 = vld [vmem:[#allocation8 + $0x244] sm:$0xf]  ;;  %v4092_v50 = vld [vmem:[#allocation8 + $0x250] sm:$0xf0] }
 0x10e   :  { %2521 = vmatpush.bf16.msra.mxu3 %v3887_v53  ;;  %v3807_v53 = vor.u32 %v4636_v38, %v3804_v40  ;;  %v4651_v40 = vld [vmem:[#allocation8 + $0x74] sm:$0xf0] }
 0x10f   :  { %v1484_v25 = vpop.f32.mrf.mxu2  ;;  %v3859_v47 = vor.u32 %v4651_v40, %v3858_v32  ;;  %v4661_v32 = vld [vmem:[#allocation8 + $0xcc] sm:$0xf]  ;;  %v3908_v40 = vld [vmem:[#allocation8 + $0xd8] sm:$0xf0] }
 0x110   :  { %2535 = vmatpush.bf16.msra.mxu1 %v3999_v37  ;;  %2545 = vmatpush.bf16.msra.mxu2 %v4175_v57  ;;  %v4140_v37 = vld [vmem:[#allocation8 + $0x2b0] sm:$0xf0]  ;;  %v4234_v25 = vld [vmem:[#allocation8 + $0x360] sm:$0xf]  ;;  %v3911_v48 = vor.u32 %v4661_v32, %v3908_v40  ;;  %v3828_v40 = vld [vmem:[#allocation8 + $0x38] sm:$0xf0] }
 0x111   :  { %v4143_v10 = vor.u32 %v4720_v5, %v4140_v37  ;;  %v4742_v5 = vld [vmem:[#allocation8 + $0x34c] sm:$0xf0]  ;;  %v3986_v37 = vld [vmem:[#allocation8 + $0x168] sm:$0xf] }
 0x112   :  { %2522 = vmatpush.bf16.msra.mxu3 %v3871_v62  ;;  %v4298_v62 = vld [vmem:[#allocation8 + $0x3e0] sm:$0xf]  ;;  %v4219_v9 = vor.u32 %v4742_v5, %v4218_v4  ;;  %v4693_v5 = vld [vmem:[#allocation8 + $0x1cc] sm:$0xf] }
 0x113   :  { %v4299_v0 = vor.u32 %v4762_v63, %v4298_v62 }
 0x114   :  { %2536 = vmatpush.bf16.msra.mxu1 %v3983_v45  ;;  %2546 = vmatpush.bf16.msra.mxu2 %v4159_v61  ;;  %v1495_v8 = vpop.f32.mrf.mxu3  ;;  %v3874_v45 = vld [vmem:[#allocation8 + $0x88] sm:$0xf]  ;;  %v4076_v61 = vld [vmem:[#allocation8 + $0x230] sm:$0xf0] }
 0x115   :  { %2506 = vmatpush.bf16.msrb.mxu0 %v4299_v0  ;;  %v1496_v13 = vadd.f32 %v1495_v8, %v1483_v1  ;;  %v3875_v29 = vor.u32 %v4655_v19, %v3874_v45  ;;  %v4643_v1 = vld [vmem:[#allocation8 + $0x34] sm:$0xf0]  ;;  %v4202_v19 = vld [vmem:[#allocation8 + $0x320] sm:$0xf] }
 0x116   :  { %2523 = vmatpush.bf16.msra.mxu3 %v3855_v11  ;;  %v4282_v11 = vld [vmem:[#allocation8 + $0x3c0] sm:$0xf]  ;;  %v4683_v8 = vld [vmem:[#allocation8 + $0x174] sm:$0xf0] }
 0x117   :  { %v4283_v55 = vor.u32 %v4758_v12, %v4282_v11  ;;  %v1682_v17 = vmax.f32 %v1496_v13, 0.0  ;;  %v3810_v11 = vld [vmem:[#allocation8 + $0x8] sm:$0xf]  ;;  %v3827_v13 = vor.u32 %v4643_v1, %v3826_v59  ;;  %v3987_v45 = vor.u32 %v4683_v8, %v3986_v37  ;;  %v4752_v1 = vld [vmem:[#allocation8 + $0x3a4] sm:$0xf] }
 0x118   :  { %2537 = vmatpush.bf16.msra.mxu1 %v3967_v31  ;;  %2547 = vmatpush.bf16.msra.mxu2 %v4143_v10 }
 0x119   :  { %2507 = vmatpush.bf16.msrb.mxu0 %v4283_v55  ;;  %v5124_v7 = vpack.c.bf16 %v1682_v17, %v1682_v17  ;;  %v4060_v55 = vld [vmem:[#allocation8 + $0x210] sm:$0xf0]  ;;  %v3970_v17 = vld [vmem:[#allocation8 + $0x148] sm:$0xf] }
 0x11a   :  { %2524 = vmatpush.bf16.msra.mxu3 %v3839_v23  ;;  %v4266_v23 = vld [vmem:[#allocation8 + $0x3a0] sm:$0xf] }
 0x11b   :  { %v4267_v31 = vor.u32 %v4754_v24, %v4266_v23  ;;  %2488 = vmatmul.bf16.vlgmr.msrb.gmra.mxu1 %v5124_v7  ;;  %v5127_v38 = vpop.f32.mrf.mxu0  ;;  %v3924_v23 = vld [vmem:[#allocation8 + $0xf8] sm:$0xf0]  ;;  %v4203_v24 = vor.u32 %v4738_v20, %v4202_v19  ;;  %v4645_v19 = vld [vmem:[#allocation8 + $0x4c] sm:$0xf] }
 0x11c   :  { %2538 = vmatpush.bf16.msra.mxu1 %v3951_v16  ;;  %v1497_v36 = vpop.f32.mrf.mxu3  ;;  %2548 = vmatpush.bf16.msra.mxu2 %v4127_v28  ;;  %v4018_v16 = vld [vmem:[#allocation8 + $0x1a8] sm:$0xf]  ;;  %v5129_v46 = vpop.f32.mrf.mxu1  ;;  %v4675_v28 = vld [vmem:[#allocation8 + $0x134] sm:$0xf0] }
 0x11d   :  { %2508 = vmatpush.bf16.msrb.mxu0 %v4267_v31  ;;  %v4019_v57 = vor.u32 %v4691_v6, %v4018_v16  ;;  %v4186_v36 = vld [vmem:[#allocation8 + $0x300] sm:$0xf]  ;;  %v327_v16 = vperm.slane %v5097_v2, 2 }
 0x11e   :  { %2525 = vmatpush.bf16.msra.mxu3 %v3823_v39  ;;  %v4035_v39 = vor.u32 %v4695_v27, %v4034_v26  ;;  %v3811_v26 = vor.u32 %v4639_v14, %v3810_v11  ;;  %v3954_v27 = vld [vmem:[#allocation8 + $0x128] sm:$0xf]  ;;  %v4649_v11 = vld [vmem:[#allocation8 + $0x6c] sm:$0xf]  ;;  %v4748_v14 = vld [vmem:[#allocation8 + $0x384] sm:$0xf] }
 0x120   :  { %2539 = vmatpush.bf16.msra.mxu1 %v3935_v35  ;;  %2549 = vmatpush.bf16.msra.mxu2 %v4111_v41  ;;  %v4235_v35 = vor.u32 %v4746_v54, %v4234_v25  ;;  %v4284_v25 = vld [vmem:[#allocation8 + $0x3d0] sm:$0xf0]  ;;  %v1509_v54 = vadd.f32 %v5129_v46, %v327_v16  ;;  %v4036_v46 = vld [vmem:[#allocation8 + $0x1d8] sm:$0xf0]  ;;  %v4681_v16 = vld [vmem:[#allocation8 + $0x16c] sm:$0xf] }
 0x121   :  { %2509 = vmatpush.bf16.msrb.mxu0 %v4251_v44  ;;  %v4303_v44 = vor.u32 %v4760_v42, %v4300_v43  ;;  %v4220_v42 = vld [vmem:[#allocation8 + $0x350] sm:$0xf0] }
 0x122   :  { %2526 = vmatpush.bf16.msra.mxu3 %v3807_v53  ;;  %v4095_v53 = vor.u32 %v4708_v49, %v4092_v50  ;;  %v3938_v49 = vld [vmem:[#allocation8 + $0x108] sm:$0xf]  ;;  %v4671_v50 = vld [vmem:[#allocation8 + $0x114] sm:$0xf0] }
 0x123   :  { %v1536_v63 = vpop.f32.mrf.mxu0 }
 0x124   :  { %2584 = vmatpush.bf16.msrb.mxu1 %v4051_v21  ;;  %2550 = vmatpush.bf16.msra.mxu2 %v4095_v53  ;;  %v1510_v12 = vpop.f32.mrf.mxu1  ;;  %v4679_v21 = vld [vmem:[#allocation8 + $0x154] sm:$0xf0]  ;;  %v4756_v53 = vld [vmem:[#allocation8 + $0x3c4] sm:$0xf] }
 0x125   :  { %2527 = vmatmul.bf16.vlgmr.msra.gmra.mxu3 %v5117_v51  ;;  %2510 = vmatpush.bf16.msrb.mxu0 %v4235_v35  ;;  %v3971_v31 = vor.u32 %v4679_v21, %v3970_v17  ;;  %v4287_v35 = vor.u32 %v4756_v53, %v4284_v25  ;;  %v4039_v12 = vor.u32 %v4693_v5, %v4036_v46  ;;  %v4020_v17 = vld [vmem:[#allocation8 + $0x1b8] sm:$0xf0]  ;;  %v4736_v25 = vld [vmem:[#allocation8 + $0x324] sm:$0xf]  ;;  %v4188_v5 = vld [vmem:[#allocation8 + $0x310] sm:$0xf0] }
 0x126   :  { %2571 = vmatpush.bf16.msrb.mxu3 %v3923_v30  ;;  %v4002_v30 = vld [vmem:[#allocation8 + $0x188] sm:$0xf]  ;;  %v3844_v21 = vld [vmem:[#allocation8 + $0x58] sm:$0xf0]  ;;  %v4673_v46 = vld [vmem:[#allocation8 + $0x12c] sm:$0xf] }
 0x127   :  { %v4003_v0 = vor.u32 %v4687_v56, %v4002_v30  ;;  %v5133_v10 = vpop.f32.mrf.mxu2  ;;  %v4697_v30 = vld [vmem:[#allocation8 + $0x1ec] sm:$0xf]  ;;  %v4052_v56 = vld [vmem:[#allocation8 + $0x1f8] sm:$0xf0] }
 0x128   :  { %2585 = vmatpush.bf16.msrb.mxu1 %v4035_v39  ;;  %v5131_v62 = vpop.f32.mrf.mxu3  ;;  %v4734_v39 = vld [vmem:[#allocation8 + $0x30c] sm:$0xf0]  ;;  %v4055_v63 = vor.u32 %v4697_v30, %v4052_v56  ;;  %v3812_v53 = vld [vmem:[#allocation8 + $0x18] sm:$0xf0]  ;;  %v4677_v56 = vld [vmem:[#allocation8 + $0x14c] sm:$0xf] }
 0x129   :  { %2511 = vmatpush.bf16.msrb.mxu0 %v4219_v9  ;;  %v4187_v41 = vor.u32 %v4734_v39, %v4186_v36  ;;  %v1522_v4 = vadd.f32 %v5131_v62, %v1509_v54  ;;  %v4204_v54 = vld [vmem:[#allocation8 + $0x330] sm:$0xf0] }
 0x12a   :  { %2572 = vmatpush.bf16.msrb.mxu3 %v3907_v3  ;;  %v4079_v3 = vor.u32 %v4704_v60, %v4076_v61  ;;  %v4653_v60 = vld [vmem:[#allocation8 + $0x8c] sm:$0xf] }
 0x12b   :  { %2540 = vmatmul.bf16.vlgmr.msra.gmra.mxu1 %v5124_v7  ;;  %v5136_v34 = vpop.f32.mrf.mxu0 }
 0x12c   :  { %2586 = vmatpush.bf16.msrb.mxu1 %v4019_v57  ;;  %2551 = vmatpush.bf16.msra.mxu2 %v4079_v3  ;;  %v4657_v57 = vld [vmem:[#allocation8 + $0xac] sm:$0xf]  ;;  %v4268_v3 = vld [vmem:[#allocation8 + $0x3b0] sm:$0xf0] }
 0x12d   :  { %2512 = vmatpush.bf16.msrb.mxu0 %v4203_v24  ;;  %v3895_v59 = vor.u32 %v4657_v57, %v3892_v52  ;;  %v4271_v37 = vor.u32 %v4752_v1, %v4268_v3  ;;  %v4637_v57 = vld [vmem:[#allocation8 + $0xc] sm:$0xf] }
 0x12e   :  { %2573 = vmatpush.bf16.msrb.mxu3 %v3891_v18  ;;  %v4063_v18 = vor.u32 %v4700_v15, %v4060_v55  ;;  %v4252_v15 = vld [vmem:[#allocation8 + $0x390] sm:$0xf0]  ;;  %v1535_v55 = vadd.f32 %v5127_v38, %v1522_v4  ;;  %v4732_v4 = vld [vmem:[#allocation8 + $0x304] sm:$0xf] }
 0x12f   :  { %v1549_v6 = vpop.f32.mrf.mxu2  ;;  %v4255_v62 = vor.u32 %v4748_v14, %v4252_v15  ;;  %v4669_v15 = vld [vmem:[#allocation8 + $0x10c] sm:$0xf] }
 0x130   :  { %2587 = vmatpush.bf16.msrb.mxu1 %v4003_v0  ;;  %v1523_v33 = vpop.f32.mrf.mxu3  ;;  %2552 = vmatpush.bf16.msra.mxu2 %v4063_v18  ;;  %v3876_v0 = vld [vmem:[#allocation8 + $0x98] sm:$0xf0]  ;;  %v1548_v24 = vadd.f32 %v5133_v10, %v1535_v55 }
 0x131   :  { %2513 = vmatpush.bf16.msrb.mxu0 %v4187_v41  ;;  %v3879_v9 = vor.u32 %v4653_v60, %v3876_v0  ;;  %v4641_v33 = vld [vmem:[#allocation8 + $0x2c] sm:$0xf]  ;;  %v4740_v41 = vld [vmem:[#allocation8 + $0x344] sm:$0xf]  ;;  %v3988_v10 = vld [vmem:[#allocation8 + $0x178] sm:$0xf0] }
 0x132   :  { %2574 = vmatpush.bf16.msrb.mxu3 %v3875_v29  ;;  %v3927_v29 = vor.u32 %v4665_v22, %v3924_v23  ;;  %v4744_v22 = vld [vmem:[#allocation8 + $0x364] sm:$0xf]  ;;  %v4236_v23 = vld [vmem:[#allocation8 + $0x370] sm:$0xf0]  ;;  %v3991_v52 = vor.u32 %v4681_v16, %v3988_v10  ;;  %v4727_v0 = vld [vmem:[#allocation8 + $0x2d4] sm:$0xf0] }
 0x133   :  { %v1588_v61 = vpop.f32.mrf.mxu0  ;;  %v4239_v38 = vor.u32 %v4744_v22, %v4236_v23  ;;  %v3940_v55 = vld [vmem:[#allocation8 + $0x118] sm:$0xf0]  ;;  %v4715_v22 = vld [vmem:[#allocation8 + $0x274] sm:$0xf0]  ;;  %v4729_v10 = vld [vmem:[#allocation8 + $0x2ec] sm:$0xf] }
 0x134   :  { %2588 = vmatpush.bf16.msrb.mxu1 %v3987_v45  ;;  %v4689_v45 = vld [vmem:[#allocation8 + $0x1ac] sm:$0xf] }
 0x135   :  { %2558 = vmatpush.bf16.msra.mxu0 %v4303_v44  ;;  %v4023_v20 = vor.u32 %v4689_v45, %v4020_v17  ;;  %v4223_v44 = vor.u32 %v4740_v41, %v4220_v42  ;;  %v4130_v17 = vld [vmem:[#allocation8 + $0x288] sm:$0xf] }
 0x136   :  { %2575 = vmatpush.bf16.msrb.mxu3 %v3859_v47  ;;  %v3955_v47 = vor.u32 %v4675_v28, %v3954_v27  ;;  %v4004_v27 = vld [vmem:[#allocation8 + $0x198] sm:$0xf0] }
 0x138   :  { %2589 = vmatpush.bf16.msrb.mxu1 %v3971_v31 }
 0x139   :  { %2559 = vmatpush.bf16.msra.mxu0 %v4287_v35  ;;  %v3972_v35 = vld [vmem:[#allocation8 + $0x158] sm:$0xf0] }
 0x13a   :  { %2576 = vmatpush.bf16.msrb.mxu3 %v3843_v58  ;;  %v3939_v58 = vor.u32 %v4671_v50, %v3938_v49  ;;  %v4178_v49 = vld [vmem:[#allocation8 + $0x2e8] sm:$0xf]  ;;  %v4731_v50 = vld [vmem:[#allocation8 + $0x2f4] sm:$0xf0]  ;;  %v3975_v1 = vor.u32 %v4677_v56, %v3972_v35 }
 0x13b   :  { %v4179_v60 = vor.u32 %v4731_v50, %v4178_v49  ;;  %v4725_v50 = vld [vmem:[#allocation8 + $0x2cc] sm:$0xf] }
 0x13c   :  { %2590 = vmatpush.bf16.msrb.mxu1 %v3955_v47  ;;  %v1560_v8 = vpop.f32.mrf.mxu1 }
 0x13d   :  { %2560 = vmatpush.bf16.msra.mxu0 %v4271_v37  ;;  %v1561_v31 = vadd.f32 %v1560_v8, %v1548_v24  ;;  %v3956_v37 = vld [vmem:[#allocation8 + $0x138] sm:$0xf0] }
 0x13e   :  { %2577 = vmatpush.bf16.msrb.mxu3 %v3827_v13  ;;  %v3860_v13 = vld [vmem:[#allocation8 + $0x78] sm:$0xf0]  ;;  %v3959_v14 = vor.u32 %v4673_v46, %v3956_v37  ;;  %v4274_v37 = vld [vmem:[#allocation8 + $0x3a8] sm:$0xf] }
 0x13f   :  { %v3863_v18 = vor.u32 %v4649_v11, %v3860_v13  ;;  %v5145_v28 = vpop.f32.mrf.mxu0  ;;  %v4723_v13 = vld [vmem:[#allocation8 + $0x2b4] sm:$0xf0]  ;;  %v4132_v46 = vld [vmem:[#allocation8 + $0x298] sm:$0xf0] }
 0x140   :  { %2591 = vmatpush.bf16.msrb.mxu1 %v3939_v58 }
 0x141   :  { %2561 = vmatpush.bf16.msra.mxu0 %v4255_v62  ;;  %v4719_v62 = vld [vmem:[#allocation8 + $0x294] sm:$0xf0] }
 0x142   :  { %2578 = vmatpush.bf16.msrb.mxu3 %v3811_v26  ;;  %v4685_v26 = vld [vmem:[#allocation8 + $0x18c] sm:$0xf] }
 0x143   :  { %2592 = vmatmul.bf16.vlgmr.msrb.gmra.mxu1 %v5124_v7  ;;  %v4007_v39 = vor.u32 %v4685_v26, %v4004_v27  ;;  %v4098_v27 = vld [vmem:[#allocation8 + $0x248] sm:$0xf] }
 0x144   :  { %2636 = vmatpush.bf16.msra.mxu1 %v4055_v63  ;;  %v1562_v32 = vpop.f32.mrf.mxu1  ;;  %v4162_v63 = vld [vmem:[#allocation8 + $0x2c8] sm:$0xf] }
 0x145   :  { %2579 = vmatmul.bf16.vlgmr.msrb.gmra.mxu3 %v5117_v51  ;;  %2562 = vmatpush.bf16.msra.mxu0 %v4239_v38  ;;  %v4163_v11 = vor.u32 %v4727_v0, %v4162_v63  ;;  %v4707_v32 = vld [vmem:[#allocation8 + $0x234] sm:$0xf0]  ;;  %v4290_v63 = vld [vmem:[#allocation8 + $0x3c8] sm:$0xf] }
 0x146   :  { %2623 = vmatpush.bf16.msra.mxu3 %v3927_v29  ;;  %v3847_v29 = vor.u32 %v4645_v19, %v3844_v21  ;;  %v3943_v19 = vor.u32 %v4669_v15, %v3940_v55  ;;  %v4114_v21 = vld [vmem:[#allocation8 + $0x268] sm:$0xf]  ;;  %v4759_v0 = vld [vmem:[#allocation8 + $0x3d4] sm:$0xf0] }
 0x147   :  { %v1599_v6 = vpop.f32.mrf.mxu2  ;;  %v1614_v58 = vpop.f32.mrf.mxu0  ;;  %v4115_v26 = vor.u32 %v4715_v22, %v4114_v21  ;;  %v4751_v15 = vld [vmem:[#allocation8 + $0x394] sm:$0xf0]  ;;  %v4705_v22 = vld [vmem:[#allocation8 + $0x22c] sm:$0xf] }
 0x148   :  { %2637 = vmatpush.bf16.msra.mxu1 %v4039_v12  ;;  %v1573_v36 = vpop.f32.mrf.mxu3  ;;  %v4146_v12 = vld [vmem:[#allocation8 + $0x2a8] sm:$0xf] }
 0x149   :  { %v1574_v43 = vadd.f32 %v1573_v36, %v1561_v31  ;;  %2563 = vmatpush.bf16.msra.mxu0 %v4223_v44  ;;  %v4147_v45 = vor.u32 %v4723_v13, %v4146_v12  ;;  %v4713_v12 = vld [vmem:[#allocation8 + $0x26c] sm:$0xf]  ;;  %v4116_v13 = vld [vmem:[#allocation8 + $0x278] sm:$0xf0] }
 0x14a   :  { %2624 = vmatpush.bf16.msra.mxu3 %v3911_v48  ;;  %v3831_v48 = vor.u32 %v4641_v33, %v3828_v40  ;;  %v4119_v55 = vor.u32 %v4713_v12, %v4116_v13 }
 0x14b   :  { %v1587_v47 = vadd.f32 %v5136_v34, %v1574_v43  ;;  %v3815_v34 = vor.u32 %v4637_v57, %v3812_v53  ;;  %v4066_v43 = vld [vmem:[#allocation8 + $0x208] sm:$0xf]  ;;  %v4164_v57 = vld [vmem:[#allocation8 + $0x2d8] sm:$0xf0] }
 0x14c   :  { %2638 = vmatpush.bf16.msra.mxu1 %v4023_v20  ;;  %v4131_v20 = vor.u32 %v4719_v62, %v4130_v17  ;;  %v4167_v35 = vor.u32 %v4725_v50, %v4164_v57  ;;  %v4709_v17 = vld [vmem:[#allocation8 + $0x24c] sm:$0xf]  ;;  %v4100_v62 = vld [vmem:[#allocation8 + $0x258] sm:$0xf0]  ;;  %v5163_v57 = vld [vmem:[#allocation10] sm:$0xf] }
 0x14d   :  { %v1683_v30 = vmax.f32 %v1587_v47, 0.0  ;;  %v4260_v50 = vld [vmem:[#allocation8 + $0x398] sm:$0xf0] }
 0x14e   :  { %2625 = vmatpush.bf16.msra.mxu3 %v3895_v59  ;;  %v4207_v59 = vor.u32 %v4736_v25, %v4204_v54  ;;  %v4306_v25 = vld [vmem:[#allocation8 + $0x3e8] sm:$0xf]  ;;  %v4763_v54 = vld [vmem:[#allocation8 + $0x3f4] sm:$0xf0] }
 0x14f   :  { %v5148_v61 = vpack.c.bf16 %v1683_v30, %v1683_v30  ;;  %v1601_v8 = vpop.f32.mrf.mxu2  ;;  %v4307_v58 = vor.u32 %v4763_v54, %v4306_v25  ;;  %v4244_v25 = vld [vmem:[#allocation8 + $0x378] sm:$0xf0] }
 0x150   :  { %2639 = vmatpush.bf16.msra.mxu1 %v4007_v39  ;;  %v1575_v3 = vpop.f32.mrf.mxu3  ;;  %2564 = vmatpush.bf16.msra.mxu0 %v4207_v59  ;;  %v4721_v59 = vld [vmem:[#allocation8 + $0x2ac] sm:$0xf]  ;;  %v4755_v8 = vld [vmem:[#allocation8 + $0x3b4] sm:$0xf0] }
 0x151   :  { %2501 = vmatmul.bf16.vlgmr.msrb.gmra.mxu2 %v5148_v61 }
 0x152   :  { %2626 = vmatpush.bf16.msra.mxu3 %v3879_v9  ;;  %v4191_v9 = vor.u32 %v4732_v4, %v4188_v5  ;;  %2597 = vmatpush.bf16.msrb.mxu2 %v4179_v60  ;;  %v4148_v60 = vld [vmem:[#allocation8 + $0x2b8] sm:$0xf0]  ;;  %v4291_v4 = vor.u32 %v4759_v0, %v4290_v63  ;;  %v4717_v5 = vld [vmem:[#allocation8 + $0x28c] sm:$0xf] }
 0x153   :  { %v4737_v0 = vld [vmem:[#allocation8 + $0x32c] sm:$0xf] }
 0x154   :  { %2640 = vmatpush.bf16.msra.mxu1 %v3991_v52  ;;  %2565 = vmatpush.bf16.msra.mxu0 %v4191_v9  ;;  %v4135_v9 = vor.u32 %v4717_v5, %v4132_v46  ;;  %v4196_v5 = vld [vmem:[#allocation8 + $0x318] sm:$0xf0] }
 0x156   :  { %2627 = vmatpush.bf16.msra.mxu3 %v3863_v18  ;;  %2598 = vmatpush.bf16.msrb.mxu2 %v4163_v11  ;;  %v328_v18 = vperm.slane %v5097_v2, 3  ;;  %v4275_v11 = vor.u32 %v4755_v8, %v4274_v37 }
 0x158   :  { %2641 = vmatpush.bf16.msra.mxu1 %v3975_v1  ;;  %v1600_v23 = vadd.f32 %v1599_v6, %v328_v18  ;;  %v4180_v6 = vld [vmem:[#allocation8 + $0x2f8] sm:$0xf0]  ;;  %v4151_v1 = vor.u32 %v4721_v59, %v4148_v60  ;;  %v4242_v18 = vld [vmem:[#allocation8 + $0x368] sm:$0xf] }
 0x15a   :  { %2628 = vmatpush.bf16.msra.mxu3 %v3847_v29  ;;  %2599 = vmatpush.bf16.msrb.mxu2 %v4147_v45  ;;  %v1613_v38 = vadd.f32 %v5145_v28, %v1600_v23  ;;  %v4082_v29 = vld [vmem:[#allocation8 + $0x228] sm:$0xf]  ;;  %v4084_v23 = vld [vmem:[#allocation8 + $0x238] sm:$0xf0] }
 0x15b   :  { %v4083_v42 = vor.u32 %v4707_v32, %v4082_v29  ;;  %v4210_v29 = vld [vmem:[#allocation8 + $0x328] sm:$0xf]  ;;  %v4739_v32 = vld [vmem:[#allocation8 + $0x334] sm:$0xf0] }
 0x15c   :  { %2642 = vmatpush.bf16.msra.mxu1 %v3959_v14  ;;  %v1625_v24 = vpop.f32.mrf.mxu1  ;;  %v4258_v14 = vld [vmem:[#allocation8 + $0x388] sm:$0xf] }
 0x15d   :  { %v1626_v33 = vadd.f32 %v1625_v24, %v1613_v38  ;;  %v4259_v45 = vor.u32 %v4751_v15, %v4258_v14  ;;  %v4226_v24 = vld [vmem:[#allocation8 + $0x348] sm:$0xf]  ;;  %v4771_v14 = vld [vmem:[#allocation11 + $0x38] sm:$0xff] }
 0x15e   :  { %2629 = vmatpush.bf16.msra.mxu3 %v3831_v48  ;;  %2600 = vmatpush.bf16.msrb.mxu2 %v4131_v20  ;;  %v4183_v48 = vor.u32 %v4729_v10, %v4180_v6  ;;  %v4103_v20 = vor.u32 %v4709_v17, %v4100_v62  ;;  %v4757_v10 = vld [vmem:[#allocation8 + $0x3cc] sm:$0xf]  ;;  %v4292_v6 = vld [vmem:[#allocation8 + $0x3d8] sm:$0xf0] }
 0x15f   :  { %v1664_v2 = vpop.f32.mrf.mxu0 }
 0x160   :  { %2643 = vmatpush.bf16.msra.mxu1 %v3943_v19  ;;  %v4747_v19 = vld [vmem:[#allocation8 + $0x374] sm:$0xf0] }
 0x161   :  { %2553 = vmatmul.bf16.vlgmr.msra.gmra.mxu2 %v5148_v61  ;;  %v4243_v21 = vor.u32 %v4747_v19, %v4242_v18  ;;  %v4769_v18 = vld [vmem:[#allocation11 + $0x28] sm:$0xff] }
 0x162   :  { %2630 = vmatpush.bf16.msra.mxu3 %v3815_v34  ;;  %2601 = vmatpush.bf16.msrb.mxu2 %v4115_v26  ;;  %v4743_v26 = vld [vmem:[#allocation8 + $0x354] sm:$0xf0] }
 0x163   :  { %2644 = vmatmul.bf16.vlgmr.msra.gmra.mxu1 %v5124_v7  ;;  %v4703_v7 = vld [vmem:[#allocation8 + $0x214] sm:$0xf0]  ;;  %v4227_v38 = vor.u32 %v4743_v26, %v4226_v24  ;;  %v4779_v24 = vld [vmem:[#allocation11 + $0x78] sm:$0xff] }
 0x164   :  { %v1627_v36 = vpop.f32.mrf.mxu1  ;;  %v4067_v47 = vor.u32 %v4703_v7, %v4066_v43  ;;  %v4308_v43 = vld [vmem:[#allocation8 + $0x3f8] sm:$0xf0]  ;;  %2952 = vmatpush.bf16.msrb.mxu1 %v4779_v24  ;;  %v4766_v26 = vld [vmem:[#allocation11 + $0x10] sm:$0xff] }
 0x165   :  { %2631 = vmatmul.bf16.vlgmr.msra.gmra.mxu3 %v5117_v51  ;;  %v4711_v51 = vld [vmem:[#allocation8 + $0x254] sm:$0xf0]  ;;  %v4211_v36 = vor.u32 %v4739_v32, %v4210_v29  ;;  %v1822_v32 = vperm.slane %v5163_v57, 3 }
 0x166   :  { %v4099_v31 = vor.u32 %v4711_v51, %v4098_v27  ;;  %v4087_v51 = vor.u32 %v4705_v22, %v4084_v23  ;;  %2939 = vmatpush.bf16.msrb.mxu3 %v4771_v14  ;;  %v4767_v23 = vld [vmem:[#allocation11 + $0x18] sm:$0xff]  ;;  %v4789_v14 = vld [vmem:[#allocation11 + $0xc8] sm:$0xff] }
 0x167   :  { %v1651_v41 = vpop.f32.mrf.mxu2  ;;  %v1666_v28 = vpop.f32.mrf.mxu0 }
 0x168   :  { %v1638_v39 = vpop.f32.mrf.mxu3  ;;  %2602 = vmatpush.bf16.msrb.mxu2 %v4099_v31  ;;  %v4068_v31 = vld [vmem:[#allocation8 + $0x218] sm:$0xf0]  ;;  %v4295_v28 = vor.u32 %v4757_v10, %v4292_v6  ;;  %v4773_v10 = vld [vmem:[#allocation11 + $0x48] sm:$0xff] }
 0x169   :  { %v1639_v40 = vadd.f32 %v1638_v39, %v1626_v33  ;;  %v4194_v39 = vld [vmem:[#allocation8 + $0x308] sm:$0xf]  ;;  %v4785_v6 = vld [vmem:[#allocation11 + $0xa8] sm:$0xff] }
 0x16b   :  { %v1652_v16 = vadd.f32 %v1651_v41, %v1639_v40  ;;  %v4735_v40 = vld [vmem:[#allocation8 + $0x314] sm:$0xf0] }
 0x16c   :  { %2603 = vmatpush.bf16.msrb.mxu2 %v4083_v42  ;;  %v1677_v49 = vpop.f32.mrf.mxu1  ;;  %v4761_v42 = vld [vmem:[#allocation8 + $0x3ec] sm:$0xf]  ;;  %v4195_v7 = vor.u32 %v4735_v40, %v4194_v39 }
 0x16d   :  { %v1665_v44 = vadd.f32 %v1664_v2, %v1652_v16  ;;  %v4701_v2 = vld [vmem:[#allocation8 + $0x20c] sm:$0xf]  ;;  %v4311_v16 = vor.u32 %v4761_v42, %v4308_v43  ;;  %v4786_v42 = vld [vmem:[#allocation11 + $0xb0] sm:$0xff] }
 0x16e   :  { %v4071_v33 = vor.u32 %v4701_v2, %v4068_v31  ;;  %v4764_v2 = vld [vmem:[#allocation11] sm:$0xff] }
 0x16f   :  { %v1678_v52 = vadd.f32 %v1677_v49, %v1665_v44  ;;  %v1653_v30 = vpop.f32.mrf.mxu2  ;;  %v4753_v44 = vld [vmem:[#allocation8 + $0x3ac] sm:$0xf]  ;;  %v4776_v31 = vld [vmem:[#allocation11 + $0x60] sm:$0xff] }
 0x170   :  { %v1640_v53 = vpop.f32.mrf.mxu3  ;;  %2604 = vmatpush.bf16.msrb.mxu2 %v4067_v47  ;;  %v4276_v47 = vld [vmem:[#allocation8 + $0x3b8] sm:$0xf0]  ;;  %v4749_v49 = vld [vmem:[#allocation8 + $0x38c] sm:$0xf] }
 0x171   :  { %v1684_v56 = vmax.f32 %v1678_v52, 0.0  ;;  %v4263_v52 = vor.u32 %v4749_v49, %v4260_v50  ;;  %v1819_v53 = vperm.slane %v5163_v57, 0  ;;  %v4783_v50 = vld [vmem:[#allocation11 + $0x98] sm:$0xff] }
 0x173   :  { %v5156_v34 = vpack.c.bf16 %v1684_v56, %v1684_v56  ;;  %2605 = vmatmul.bf16.vlgmr.msrb.gmra.mxu2 %v5148_v61  ;;  %v4741_v56 = vld [vmem:[#allocation8 + $0x34c] sm:$0xf] }
 0x174   :  { %2649 = vmatpush.bf16.msra.mxu2 %v4183_v48  ;;  %v1679_v3 = vpop.f32.mrf.mxu1  ;;  %v4279_v48 = vor.u32 %v4753_v44, %v4276_v47  ;;  %v4772_v44 = vld [vmem:[#allocation11 + $0x40] sm:$0xff] }
 0x175   :  { %2514 = vmatmul.bf16.vlgmr.msrb.gmra.mxu0 %v5156_v34  ;;  %v4784_v47 = vld [vmem:[#allocation11 + $0xa0] sm:$0xff] }
 0x176   :  { %2610 = vmatpush.bf16.msrb.mxu0 %v4307_v58 }
 0x178   :  { %2650 = vmatpush.bf16.msra.mxu2 %v4167_v35  ;;  %v4228_v35 = vld [vmem:[#allocation8 + $0x358] sm:$0xf0] }
 0x179   :  { %v4231_v63 = vor.u32 %v4741_v56, %v4228_v35  ;;  %v4780_v56 = vld [vmem:[#allocation11 + $0x80] sm:$0xff]  ;;  %v4795_v35 = vld [vmem:[#allocation11 + $0xf8] sm:$0xff] }
 0x17a   :  { %2611 = vmatpush.bf16.msrb.mxu0 %v4291_v4  ;;  %v4733_v4 = vld [vmem:[#allocation8 + $0x30c] sm:$0xf] }
 0x17b   :  { %v4199_v8 = vor.u32 %v4733_v4, %v4196_v5  ;;  %v4792_v4 = vld [vmem:[#allocation11 + $0xe0] sm:$0xff] }
 0x17c   :  { %2651 = vmatpush.bf16.msra.mxu2 %v4151_v1  ;;  %v4212_v1 = vld [vmem:[#allocation8 + $0x338] sm:$0xf0] }
 0x17d   :  { %v4215_v3 = vor.u32 %v4737_v0, %v4212_v1  ;;  %v4793_v1 = vld [vmem:[#allocation11 + $0xe8] sm:$0xff] }
 0x17e   :  { %2612 = vmatpush.bf16.msrb.mxu0 %v4275_v11 }
 0x180   :  { %2652 = vmatpush.bf16.msra.mxu2 %v4135_v9  ;;  %v1820_v9 = vperm.slane %v5163_v57, 1 }
 0x182   :  { %2613 = vmatpush.bf16.msrb.mxu0 %v4259_v45  ;;  %v4770_v45 = vld [vmem:[#allocation11 + $0x30] sm:$0xff] }
 0x183   :  { %2940 = vmatpush.bf16.msrb.mxu3 %v4770_v45 }
 0x184   :  { %2653 = vmatpush.bf16.msra.mxu2 %v4119_v55  ;;  %v1821_v55 = vperm.slane %v5163_v57, 2  ;;  %v4782_v57 = vld [vmem:[#allocation11 + $0x90] sm:$0xff] }
 0x185   :  { %2566 = vmatmul.bf16.vlgmr.msra.gmra.mxu0 %v5156_v34 }
 0x186   :  { %2614 = vmatpush.bf16.msrb.mxu0 %v4243_v21  ;;  %v4768_v21 = vld [vmem:[#allocation11 + $0x20] sm:$0xff] }
 0x187   :  { %2941 = vmatpush.bf16.msrb.mxu3 %v4769_v18 }
 0x188   :  { %v2476_v27 = vpop.f32.mrf.mxu3  ;;  %2654 = vmatpush.bf16.msra.mxu2 %v4103_v20 }
 0x189   :  { %v2477_v30 = vadd.f32 %v2476_v27, %v1819_v53  ;;  %v4778_v27 = vld [vmem:[#allocation11 + $0x70] sm:$0xff] }
 0x18a   :  { %2615 = vmatpush.bf16.msrb.mxu0 %v4227_v38  ;;  %2953 = vmatpush.bf16.msrb.mxu1 %v4778_v27  ;;  %v4777_v38 = vld [vmem:[#allocation11 + $0x68] sm:$0xff] }
 0x18b   :  { %2942 = vmatpush.bf16.msrb.mxu3 %v4768_v21 }
 0x18c   :  { %2655 = vmatpush.bf16.msra.mxu2 %v4087_v51  ;;  %v4765_v51 = vld [vmem:[#allocation11 + $0x8] sm:$0xff] }
 0x18e   :  { %2616 = vmatpush.bf16.msrb.mxu0 %v4211_v36  ;;  %2954 = vmatpush.bf16.msrb.mxu1 %v4777_v38  ;;  %v4787_v36 = vld [vmem:[#allocation11 + $0xb8] sm:$0xff] }
 0x18f   :  { %2943 = vmatpush.bf16.msrb.mxu3 %v4767_v23 }
 0x190   :  { %v2478_v41 = vpop.f32.mrf.mxu3  ;;  %2656 = vmatpush.bf16.msra.mxu2 %v4071_v33  ;;  %v4775_v33 = vld [vmem:[#allocation11 + $0x58] sm:$0xff] }
 0x191   :  { %v4774_v41 = vld [vmem:[#allocation11 + $0x50] sm:$0xff] }
 0x192   :  { %2617 = vmatpush.bf16.msrb.mxu0 %v4195_v7  ;;  %2955 = vmatpush.bf16.msrb.mxu1 %v4776_v31 }
 0x193   :  { %2657 = vmatmul.bf16.vlgmr.msra.gmra.mxu2 %v5148_v61  ;;  %v4745_v61 = vld [vmem:[#allocation8 + $0x36c] sm:$0xf]  ;;  %2944 = vmatpush.bf16.msrb.mxu3 %v4766_v26 }
 0x194   :  { %v4247_v54 = vor.u32 %v4745_v61, %v4244_v25  ;;  %2965 = vmatpush.bf16.msrb.mxu2 %v4787_v36  ;;  %v4781_v61 = vld [vmem:[#allocation11 + $0x88] sm:$0xff] }
 0x195   :  { %2618 = vmatmul.bf16.vlgmr.msrb.gmra.mxu0 %v5156_v34 }
 0x196   :  { %2662 = vmatpush.bf16.msra.mxu0 %v4311_v16  ;;  %2956 = vmatpush.bf16.msrb.mxu1 %v4775_v33 }
 0x197   :  { %2945 = vmatpush.bf16.msrb.mxu3 %v4765_v51 }
 0x198   :  { %v2489_v58 = vpop.f32.mrf.mxu1  ;;  %2966 = vmatpush.bf16.msrb.mxu2 %v4786_v42 }
 0x199   :  { %v5166_v60 = vadd.f32 %v2489_v58, %v2477_v30 }
 0x19a   :  { %2663 = vmatpush.bf16.msra.mxu0 %v4295_v28  ;;  %2957 = vmatpush.bf16.msrb.mxu1 %v4774_v41 }
 0x19b   :  { %2946 = vmatpush.bf16.msrb.mxu3 %v4764_v2 }
 0x19c   :  { %2967 = vmatpush.bf16.msrb.mxu2 %v4785_v6 }
 0x19e   :  { %2664 = vmatpush.bf16.msra.mxu0 %v4279_v48  ;;  %2958 = vmatpush.bf16.msrb.mxu1 %v4773_v10 }
 0x1a0   :  { %v2491_v46 = vpop.f32.mrf.mxu1  ;;  %2968 = vmatpush.bf16.msrb.mxu2 %v4784_v47 }
 0x1a2   :  { %2665 = vmatpush.bf16.msra.mxu0 %v4263_v52  ;;  %2959 = vmatpush.bf16.msrb.mxu1 %v4772_v44 }
 0x1a4   :  { %2969 = vmatpush.bf16.msrb.mxu2 %v4783_v50 }
 0x1a6   :  { %2666 = vmatpush.bf16.msra.mxu0 %v4247_v54 }
 0x1a8   :  { %v2528_v59 = vpop.f32.mrf.mxu3  ;;  %v2541_v12 = vpop.f32.mrf.mxu1  ;;  %2970 = vmatpush.bf16.msrb.mxu2 %v4782_v57 }
 0x1a9   :  { %v2529_v11 = vadd.f32 %v2528_v59, %v1820_v9 }
 0x1aa   :  { %2667 = vmatpush.bf16.msra.mxu0 %v4231_v63  ;;  %v4794_v63 = vld [vmem:[#allocation11 + $0xf0] sm:$0xff] }
 0x1ab   :  { %v5169_v13 = vadd.f32 %v2541_v12, %v2529_v11  ;;  %v4790_v11 = vld [vmem:[#allocation11 + $0xd0] sm:$0xff] }
 0x1ac   :  { %2971 = vmatpush.bf16.msrb.mxu2 %v4781_v61 }
 0x1ae   :  { %2668 = vmatpush.bf16.msra.mxu0 %v4215_v3 }
 0x1b0   :  { %v2530_v37 = vpop.f32.mrf.mxu3  ;;  %v2543_v15 = vpop.f32.mrf.mxu1  ;;  %2972 = vmatpush.bf16.msrb.mxu2 %v4780_v56 }
 0x1b1   :  { %v4791_v37 = vld [vmem:[#allocation11 + $0xd8] sm:$0xff] }
 0x1b2   :  { %2669 = vmatpush.bf16.msra.mxu0 %v4199_v8 }
 0x1b5   :  { %2670 = vmatmul.bf16.vlgmr.msra.gmra.mxu0 %v5156_v34 }
 0x1b6   :  { %2978 = vmatpush.bf16.msrb.mxu0 %v4795_v35 }
 0x1ba   :  { %2979 = vmatpush.bf16.msrb.mxu0 %v4794_v63 }
 0x1be   :  { %2980 = vmatpush.bf16.msrb.mxu0 %v4793_v1 }
 0x1c0   :  { %v2593_v19 = vpop.f32.mrf.mxu1 }
 0x1c2   :  { %2981 = vmatpush.bf16.msrb.mxu0 %v4792_v4 }
 0x1c6   :  { %2982 = vmatpush.bf16.msrb.mxu0 %v4791_v37 }
 0x1c8   :  { %v2580_v17 = vpop.f32.mrf.mxu3  ;;  %v2595_v34 = vpop.f32.mrf.mxu1 }
 0x1c9   :  { %v2581_v62 = vadd.f32 %v2580_v17, %v1821_v55  ;;  %v4788_v55 = vld [vmem:[#allocation11 + $0xc0] sm:$0xff] }
 0x1ca   :  { %2983 = vmatpush.bf16.msrb.mxu0 %v4790_v11 }
 0x1cb   :  { %v5173_v20 = vadd.f32 %v2593_v19, %v2581_v62 }
 0x1ce   :  { %2984 = vmatpush.bf16.msrb.mxu0 %v4789_v14 }
 0x1d0   :  { %v2582_v22 = vpop.f32.mrf.mxu3 }
 0x1d2   :  { %2985 = vmatpush.bf16.msrb.mxu0 %v4788_v55 }
 0x1d4   :  { %v2502_v29 = vpop.f32.mrf.mxu2 }
 0x1d5   :  { %v2503_v53 = vadd.f32 %v2502_v29, %v5166_v60 }
 0x1dc   :  { %v2504_v7 = vpop.f32.mrf.mxu2 }
 0x1e0   :  { %v2645_v43 = vpop.f32.mrf.mxu1 }
 0x1e4   :  { %v2554_v49 = vpop.f32.mrf.mxu2 }
 0x1e5   :  { %v2555_v60 = vadd.f32 %v2554_v49, %v5169_v13 }
 0x1e8   :  { %v2632_v39 = vpop.f32.mrf.mxu3  ;;  %v2647_v48 = vpop.f32.mrf.mxu1 }
 0x1e9   :  { %v2633_v40 = vadd.f32 %v2632_v39, %v1822_v32 }
 0x1eb   :  { %v5176_v16 = vadd.f32 %v2645_v43, %v2633_v40 }
 0x1ec   :  { %v2556_v52 = vpop.f32.mrf.mxu2 }
 0x1f0   :  { %v2634_v28 = vpop.f32.mrf.mxu3 }
 0x1f2   :  { %v2515_v25 = vpop.f32.mrf.mxu0 }
 0x1f3   :  { %v2516_v54 = vadd.f32 %v2515_v25, %v2503_v53 }
 0x1f5   :  { %v2675_v30 = vmax.f32 %v2516_v54, 0.0 }
 0x1f6   :  { %v2606_v58 = vpop.f32.mrf.mxu2 }
 0x1f7   :  { %v2679_v59 = vpack.c.bf16 %v2675_v30, %v2675_v30  ;;  %v2607_v15 = vadd.f32 %v2606_v58, %v5173_v20 }
 0x1f9   :  { %2947 = vmatmul.bf16.vlgmr.msrb.gmra.mxu3 %v2679_v59 }
 0x1fa   :  { %v2517_v0 = vpop.f32.mrf.mxu0 }
 0x1fe   :  { %v2608_v3 = vpop.f32.mrf.mxu2 }
 0x202   :  { %v2567_v5 = vpop.f32.mrf.mxu0 }
 0x203   :  { %v2568_v46 = vadd.f32 %v2567_v5, %v2555_v60 }
 0x205   :  { %v2676_v8 = vmax.f32 %v2568_v46, 0.0 }
 0x207   :  { %v2680_v9 = vpack.c.bf16 %v2676_v8, %v2676_v8 }
 0x209   :  { %2960 = vmatmul.bf16.vlgmr.msrb.gmra.mxu1 %v2680_v9 }
 0x20a   :  { %v2569_v12 = vpop.f32.mrf.mxu0 }
 0x212   :  { %v2619_v45 = vpop.f32.mrf.mxu0 }
 0x213   :  { %v2620_v17 = vadd.f32 %v2619_v45, %v2607_v15 }
 0x215   :  { %v2677_v13 = vmax.f32 %v2620_v17, 0.0 }
 0x216   :  { %v2658_v62 = vpop.f32.mrf.mxu2 }
 0x217   :  { %v2681_v18 = vpack.c.bf16 %v2677_v13, %v2677_v13  ;;  %v2659_v22 = vadd.f32 %v2658_v62, %v5176_v16 }
 0x219   :  { %2973 = vmatmul.bf16.vlgmr.msrb.gmra.mxu2 %v2681_v18 }
 0x21a   :  { %v2621_v19 = vpop.f32.mrf.mxu0 }
 0x21e   :  { %v2660_v21 = vpop.f32.mrf.mxu2 }
 0x232   :  { %v2671_v23 = vpop.f32.mrf.mxu0 }
 0x233   :  { %v2672_v24 = vadd.f32 %v2671_v23, %v2659_v22 }
 0x235   :  { %v2678_v34 = vmax.f32 %v2672_v24, 0.0 }
 0x237   :  { %v2682_v26 = vpack.c.bf16 %v2678_v34, %v2678_v34 }
 0x239   :  { %2986 = vmatmul.bf16.vlgmr.msrb.gmra.mxu0 %v2682_v26 }
 0x23a   :  { %v2673_v27 = vpop.f32.mrf.mxu0 }
 0x27c   :  { %v2948_v51 = vpop.f32.mrf.mxu3 }
 0x284   :  { %v2950_v20 = vpop.f32.mrf.mxu3 }
 0x286   :  { %v2961_v38 = vpop.f32.mrf.mxu1 }
 0x287   :  { %v2962_v32 = vadd.f32 %v2961_v38, %v2948_v51 }
 0x28e   :  { %v2963_v2 = vpop.f32.mrf.mxu1 }
 0x29c   :  { %v2974_v31 = vpop.f32.mrf.mxu2 }
 0x29d   :  { %v2975_v33 = vadd.f32 %v2974_v31, %v2962_v32 }
 0x2a4   :  { %v2976_v29 = vpop.f32.mrf.mxu2 }
 0x2b6   :  { %v2987_v36 = vpop.f32.mrf.mxu0 }
 0x2b7   :  { %v2988_v39 = vadd.f32 %v2987_v36, %v2975_v33 }
 0x2b9   :  { %2991 = vst [vmem:[#allocation13] sm:$0xff] %v2988_v39 }
 0x2ba   :  { %3002 = dma.vmem_to_hbm [thread:$0]  %s2998_s5, 128, %s3000_s29, [#allocation4]  }
 0x2be   :  { %v2989_v40 = vpop.f32.mrf.mxu0 }
 0x2bf   :  { %4983 = dma.done.wait [#allocation4], 128  }
 0x2c0   :  { %4984 = vsyncadd [#allocation4], 4294967168 }
 0x2c1   :  { %3007 = vsyncpa [#allocation3], 1 }
 0x2c2   :  { %3008 = vsyncpa [#allocation6], 1 }
 0x2c3   :  { %3009 = vsyncpa [#allocation9], 1 }
 0x2c4   :  { %3010 = vsyncpa [#allocation12], 1 }
 0x2c5   :  { %3011 = vsyncpa [#allocation4], 1 }

</bundles_post_ra>
